<compile_context>
chip_gen: v7x
topology: tpu7x:2x2x1
jax: 0.10.0
libtpu: 0.0.40
codegen_flags: <defaults>
</compile_context>

<pallas_src>
import jax
import jax.numpy as jnp
from jax.experimental import pallas as pl
from jax.experimental.pallas import tpu as pltpu


# ------------------------------ Pallas kernel -------------------------------

def _fused_gnn_kernel(eps_ref,                        # SMEM (L,) f32
                      x_ref, aw_ref, ab_ref,          # atom encoder (layer 0)
                      soh_ref, dohT_ref, ea_ref,      # graph structure / edges
                      we_ref, be_ref, w1_ref, b1_ref, w2_ref, b2_ref,  # layer l
                      o_ref):                         # (Np, Dp) f32, resident
    layer = pl.program_id(0)
    last = pl.num_programs(0) - 1

    # Layer-0 prologue: fused atom encoder (bf16 matmul, f32 accumulate).
    # o_ref carries h across the whole layer grid.
    @pl.when(layer == 0)
    def _():
        o_ref[...] = (jnp.dot(x_ref[...], aw_ref[...],
                              preferred_element_type=jnp.float32)
                      + ab_ref[...])

    h = o_ref[...]                                     # (Np, Dp) f32
    h_bf = h.astype(jnp.bfloat16)

    # Gather x_j = h[src] as a bf16 one-hot matmul (one-hot rows are exact 0/1).
    x_src = jnp.dot(soh_ref[...], h_bf,
                    preferred_element_type=jnp.float32)            # (Ep, Dp)
    # GINEConv.lin(edge_attr) in bf16.
    e_emb = (jnp.dot(ea_ref[...], we_ref[...],
                     preferred_element_type=jnp.float32) + be_ref[...])
    msg = jnp.maximum(x_src + e_emb, 0.0)              # relu(x_j + lin(e))

    # Scatter-add over incoming edges: pre-transposed (Np, Ep) one-hot times
    # (Ep, Dp) messages -> plain last-dim-contracting MXU matmul.
    agg = jnp.dot(dohT_ref[...], msg.astype(jnp.bfloat16),
                  preferred_element_type=jnp.float32)               # (Np, Dp)

    # (1 + eps) * x + aggregated messages, then the GIN MLP (bf16 matmuls).
    pre = (1.0 + eps_ref[layer]) * h + agg
    h1 = jnp.maximum(
        jnp.dot(pre.astype(jnp.bfloat16), w1_ref[...],
                preferred_element_type=jnp.float32) + b1_ref[...], 0.0)
    # Second MLP linear with eval-mode BatchNorm folded in (w2*s, b2*s + t).
    out = (jnp.dot(h1.astype(jnp.bfloat16), w2_ref[...],
                   preferred_element_type=jnp.float32) + b2_ref[...])

    # TODO(synk): F.dropout is identity in inference mode; training-mode RNG
    # dropout omitted.

    # Exactly one (Np, Dp) store per layer (ReLU on all but the last layer).
    is_last = layer == last

    @pl.when(jnp.logical_not(is_last))
    def _():
        o_ref[...] = jnp.maximum(out, 0.0)

    @pl.when(is_last)
    def _():
        o_ref[...] = out


# ------------------------------ JAX wrapper ---------------------------------

def _round_up(v, m):
    return ((v + m - 1) // m) * m


def _pad2(a, shape):
    out = jnp.zeros(shape, a.dtype)
    return out.at[:a.shape[0], :a.shape[1]].set(a)


def _nbytes(a):
    return int(a.size) * a.dtype.itemsize


def gnn_node_embedding(x, src, dst, edge_attr, params, num_layer):
    """JK='last', residual=False, inference mode."""
    layers = params["layers"]
    assert num_layer == len(layers) and num_layer >= 2
    n, in_dim = x.shape
    e, edge_dim = edge_attr.shape
    emb_dim = params["atom_w"].shape[1]

    # Pad everything to lane-dense / MXU-native multiples of 128.  Exact:
    # padded one-hot rows/columns are all-zero, so padded nodes/edges never
    # feed back into real nodes (padded node rows do pick up biases after
    # layer 0, which is harmless for JK='last' without residuals; see review).
    n_pad = _round_up(n, 128)
    e_pad = _round_up(e, 128)
    d_pad = _round_up(emb_dim, 128)
    in_pad = _round_up(in_dim, 128)
    ed_pad = _round_up(edge_dim, 128)

    # bf16 activations / structure (exact 0/1 one-hots; ~0.4% rounding on data).
    x_p = _pad2(x.astype(jnp.bfloat16), (n_pad, in_pad))
    ea_p = _pad2(edge_attr.astype(jnp.bfloat16), (e_pad, ed_pad))
    # Padded edges get index -1 -> all-zero one-hot rows/cols (no contribution).
    src_p = jnp.full((e_pad,), -1, jnp.int32).at[:e].set(src.astype(jnp.int32))
    dst_p = jnp.full((e_pad,), -1, jnp.int32).at[:e].set(dst.astype(jnp.int32))
    src_oh = jax.nn.one_hot(src_p, n_pad, dtype=jnp.bfloat16)        # (Ep, Np)
    dst_ohT = jax.nn.one_hot(dst_p, n_pad, dtype=jnp.bfloat16).T     # (Np, Ep)

    # bf16 weights, f32 biases (biases are added to the f32 accumulator).
    atom_w = _pad2(params["atom_w"].astype(jnp.bfloat16), (in_pad, d_pad))
    atom_b = _pad2(params["atom_b"], (1, d_pad))

    # Stack per-layer params; fold eval-mode BatchNorm into the 2nd linear
    # (fold in f32, then cast the weight to bf16).
    eps = jnp.concatenate([p["eps"] for p in layers]).astype(jnp.float32)
    w_edge = jnp.stack([_pad2(p["w_edge"].astype(jnp.bfloat16), (ed_pad, d_pad))
                        for p in layers])
    b_edge = jnp.stack([_pad2(p["b_edge"], (1, d_pad)) for p in layers])
    w1 = jnp.stack([_pad2(p["w1"].astype(jnp.bfloat16), (d_pad, d_pad))
                    for p in layers])
    b1 = jnp.stack([_pad2(p["b1"], (1, d_pad)) for p in layers])
    w2f = jnp.stack([_pad2((p["w2"] * p["bn_scale"]).astype(jnp.bfloat16),
                           (d_pad, d_pad)) for p in layers])
    b2f = jnp.stack([_pad2(p["b2"] * p["bn_scale"] + p["bn_shift"], (1, d_pad))
                     for p in layers])

    # TODO(synk): for VMEM-constrained (v7x, large-graph) deployments, mark the
    # layer-invariant residents below with pipeline_mode=pl.Buffered(1) to
    # single-buffer them, reclaim the atom-encoder operands after layer 0
    # (run_scoped DMA or host-side atom encoder + input_output_aliases), and
    # switch the dense one-hots to a scalar-prefetch sparse gather/scatter
    # with a "parallel" node-tile axis for megacore.
    def resident(a):     # whole array, same block every layer -> stays in VMEM
        nd = a.ndim
        return pl.BlockSpec(a.shape, lambda l, _nd=nd: (0,) * _nd)

    def per_layer(a):    # leading layer axis squeezed, indexed by grid step
        nd = a.ndim - 1
        return pl.BlockSpec((None,) + a.shape[1:],
                            lambda l, _nd=nd: (l,) + (0,) * _nd)

    # Scoped-VMEM budget: residents + per-layer weight tiles + output (all
    # conservatively counted double-buffered) + elementwise temporaries,
    # with 50% headroom; floor 32 MiB, cap 64 MiB (valid on v5e/v6e/v7x).
    resident_bytes = sum(map(_nbytes, (x_p, atom_w, atom_b, src_oh, dst_ohT,
                                       ea_p)))
    per_layer_bytes = sum(_nbytes(a) // num_layer
                          for a in (w_edge, b_edge, w1, b1, w2f, b2f))
    out_bytes = n_pad * d_pad * 4
    tmp_bytes = 4 * e_pad * d_pad * 4 + 4 * n_pad * d_pad * 4
    est = 2 * (resident_bytes + per_layer_bytes + out_bytes) + tmp_bytes
    vmem_limit = int(min(64 * 2 ** 20, max(32 * 2 ** 20, int(1.5 * est))))

    out_pad = pl.pallas_call(
        _fused_gnn_kernel,
        out_shape=jax.ShapeDtypeStruct((n_pad, d_pad), jnp.float32),
        grid=(num_layer,),
        in_specs=[
            pl.BlockSpec(memory_space=pltpu.MemorySpace.SMEM),    # eps (L,)
            resident(x_p), resident(atom_w), resident(atom_b),
            resident(src_oh), resident(dst_ohT), resident(ea_p),
            per_layer(w_edge), per_layer(b_edge),
            per_layer(w1), per_layer(b1),
            per_layer(w2f), per_layer(b2f),
        ],
        out_specs=pl.BlockSpec((n_pad, d_pad), lambda l: (0, 0)),
        compiler_params=pltpu.CompilerParams(
            dimension_semantics=("arbitrary",),       # layer axis is sequential
            vmem_limit_bytes=vmem_limit),
    )(eps, x_p, atom_w, atom_b, src_oh, dst_ohT, ea_p,
      w_edge, b_edge, w1, b1, w2f, b2f)

    return out_pad[:n, :emb_dim]


# -------------------------- deterministic params ----------------------------

def init_params(key, num_layer, emb_dim, in_dim=92, edge_dim=50, bn_eps=1e-5):
    def lin(k, fan_in, fan_out):
        kw, kb = jax.random.split(k)
        lim = 1.0 / jnp.sqrt(fan_in)
        w = jax.random.uniform(kw, (fan_in, fan_out), jnp.float32, -lim, lim)
        b = jax.random.uniform(kb, (1, fan_out), jnp.float32, -lim, lim)
        return w, b

    keys = jax.random.split(key, 1 + num_layer)
    atom_w, atom_b = lin(keys[0], in_dim, emb_dim)

    layers = []
    for l in range(num_layer):
        k1, k2, k3, k4, k5 = jax.random.split(keys[1 + l], 5)
        w_edge, b_edge = lin(k1, edge_dim, emb_dim)   # GINEConv.lin(edge_attr)
        w1, b1 = lin(k2, emb_dim, emb_dim)            # GIN MLP Linear 1
        w2, b2 = lin(k3, emb_dim, emb_dim)            # GIN MLP Linear 2
        # Non-trivial eval-mode BatchNorm stats so the host-side fold is tested.
        kg, kbe, km, kv = jax.random.split(k4, 4)
        gamma = jax.random.uniform(kg, (1, emb_dim), jnp.float32, 0.8, 1.2)
        beta = 0.1 * jax.random.normal(kbe, (1, emb_dim), jnp.float32)
        rmean = 0.1 * jax.random.normal(km, (1, emb_dim), jnp.float32)
        rvar = jax.random.uniform(kv, (1, emb_dim), jnp.float32, 0.8, 1.2)
        bn_scale = gamma / jnp.sqrt(rvar + bn_eps)
        bn_shift = beta - rmean * bn_scale
        eps = jax.random.uniform(k5, (1,), jnp.float32, 0.0, 0.1)  # train_eps
        layers.append(dict(
            eps=eps, w_edge=w_edge, b_edge=b_edge,
            w1=w1, b1=b1, w2=w2, b2=b2,
            bn_scale=bn_scale, bn_shift=bn_shift,
        ))
    return dict(atom_w=atom_w, atom_b=atom_b, layers=layers)


# ---------------------------- pure-JAX reference ----------------------------

def reference(x, src, dst, edge_attr, params, num_layer):
    h = x @ params["atom_w"] + params["atom_b"]
    for l in range(num_layer):
        p = params["layers"][l]
        e_emb = edge_attr @ p["w_edge"] + p["b_edge"]
        msg = jnp.maximum(h[src] + e_emb, 0.0)
        agg = jnp.zeros_like(h).at[dst].add(msg)
        pre = (1.0 + p["eps"][0]) * h + agg
        h1 = jnp.maximum(pre @ p["w1"] + p["b1"], 0.0)
        h2 = h1 @ p["w2"] + p["b2"]
        h = h2 * p["bn_scale"] + p["bn_shift"]
        if l != num_layer - 1:
            h = jnp.maximum(h, 0.0)
    return h


# --------------------------------- main --------------------------------------

if __name__ == "__main__":
    num_layer = 2
    emb_dim = 64
    N, E = 16, 48
    IN_DIM, EDGE_DIM = 92, 50

    key = jax.random.PRNGKey(0)
    k_x, k_ea, k_src, k_dst, k_par = jax.random.split(key, 5)

    x = jax.random.normal(k_x, (N, IN_DIM), jnp.float32)          # batched_data.x
    edge_attr = jax.random.normal(k_ea, (E, EDGE_DIM), jnp.float32)
    src = jax.random.randint(k_src, (E,), 0, N, jnp.int32)        # edge_index[0]
    dst = jax.random.randint(k_dst, (E,), 0, N, jnp.int32)        # edge_index[1]

    params = init_params(k_par, num_layer, emb_dim, IN_DIM, EDGE_DIM)

    out = gnn_node_embedding(x, src, dst, edge_attr, params, num_layer)
    out = jax.block_until_ready(out)

    ref = reference(x, src, dst, edge_attr, params, num_layer)
    assert out.shape == (N, emb_dim)
    # All matmuls run in bf16 (f32 accumulation) -> tolerance relaxed vs. the
    # exact f32 reference; expected drift grows mildly with num_layer.
    assert jnp.allclose(out, ref, rtol=5e-2, atol=1e-1), "mismatch vs reference"

    print("KERNEL_OK")
</pallas_src>

<mosaic_0001>
module attributes {stable_mosaic.version = 11 : i64} {
  func.func @_fused_gnn_kernel(%arg0: i32, %arg1: memref<2xf32, #tpu.memory_space<smem>>, %arg2: memref<128x128xbf16, #tpu.memory_space<vmem>>, %arg3: memref<128x128xbf16, #tpu.memory_space<vmem>>, %arg4: memref<1x128xf32, #tpu.memory_space<vmem>>, %arg5: memref<128x128xbf16, #tpu.memory_space<vmem>>, %arg6: memref<128x128xbf16, #tpu.memory_space<vmem>>, %arg7: memref<128x128xbf16, #tpu.memory_space<vmem>>, %arg8: memref<1x128x128xbf16, #tpu.memory_space<vmem>>, %arg9: memref<1x1x128xf32, #tpu.memory_space<vmem>>, %arg10: memref<1x128x128xbf16, #tpu.memory_space<vmem>>, %arg11: memref<1x1x128xf32, #tpu.memory_space<vmem>>, %arg12: memref<1x128x128xbf16, #tpu.memory_space<vmem>>, %arg13: memref<1x1x128xf32, #tpu.memory_space<vmem>>, %arg14: memref<128x128xf32, #tpu.memory_space<vmem>>) attributes {dimension_semantics = [#tpu.dimension_semantics<arbitrary>], iteration_bounds = array<i64: 2>, scalar_prefetch = 0 : i64, scratch_operands = 0 : i64, tpu.core_type = #tpu.core_type<tc>, window_params = [{transform_indices = @transform_0, window_bounds = array<i64: 2>}, {pipeline_mode = #tpu.pipeline_mode<synchronous>, transform_indices = @transform_1, window_bounds = array<i64: 128, 128>}, {pipeline_mode = #tpu.pipeline_mode<synchronous>, transform_indices = @transform_2, window_bounds = array<i64: 128, 128>}, {pipeline_mode = #tpu.pipeline_mode<synchronous>, transform_indices = @transform_3, window_bounds = array<i64: 1, 128>}, {pipeline_mode = #tpu.pipeline_mode<synchronous>, transform_indices = @transform_4, window_bounds = array<i64: 128, 128>}, {pipeline_mode = #tpu.pipeline_mode<synchronous>, transform_indices = @transform_5, window_bounds = array<i64: 128, 128>}, {pipeline_mode = #tpu.pipeline_mode<synchronous>, transform_indices = @transform_6, window_bounds = array<i64: 128, 128>}, {transform_indices = @transform_7, window_bounds = array<i64: 1, 128, 128>}, {transform_indices = @transform_8, window_bounds = array<i64: 1, 1, 128>}, {transform_indices = @transform_9, window_bounds = array<i64: 1, 128, 128>}, {transform_indices = @transform_10, window_bounds = array<i64: 1, 1, 128>}, {transform_indices = @transform_11, window_bounds = array<i64: 1, 128, 128>}, {transform_indices = @transform_12, window_bounds = array<i64: 1, 1, 128>}, {pipeline_mode = #tpu.pipeline_mode<synchronous>, transform_indices = @transform_13, window_bounds = array<i64: 128, 128>}]} {
    %c0_i32 = arith.constant 0 : i32
    %0 = arith.cmpi eq, %arg0, %c0_i32 : i32
    %1 = arith.extui %0 : i1 to i32
    %c0_i32_0 = arith.constant 0 : i32
    %2 = arith.cmpi ne, %1, %c0_i32_0 : i32
    scf.if %2 {
      %c0_35 = arith.constant 0 : index
      %c0_36 = arith.constant 0 : index
      %51 = vector.load %arg2[%c0_35, %c0_36] : memref<128x128xbf16, #tpu.memory_space<vmem>>, vector<128x128xbf16>
      %c0_37 = arith.constant 0 : index
      %c0_38 = arith.constant 0 : index
      %52 = vector.load %arg3[%c0_37, %c0_38] : memref<128x128xbf16, #tpu.memory_space<vmem>>, vector<128x128xbf16>
      %cst_39 = arith.constant dense<0.000000e+00> : vector<128x128xf32>
      %53 = tpu.matmul %51, %52, %cst_39 {dimension_numbers = #tpu.dot_dimension_numbers<[1], [0], [0], [1], [0, 0, 1, 1], [], []>} : vector<128x128xbf16>, vector<128x128xbf16>, vector<128x128xf32> -> vector<128x128xf32>
      %c0_40 = arith.constant 0 : index
      %c0_41 = arith.constant 0 : index
      %54 = vector.load %arg4[%c0_40, %c0_41] : memref<1x128xf32, #tpu.memory_space<vmem>>, vector<1x128xf32>
      %55 = vector.broadcast %54 : vector<1x128xf32> to vector<128x128xf32>
      %56 = arith.addf %53, %55 : vector<128x128xf32>
      %c0_42 = arith.constant 0 : index
      %c0_43 = arith.constant 0 : index
      %57 = vector.load %arg14[%c0_42, %c0_43] : memref<128x128xf32, #tpu.memory_space<vmem>>, vector<128x128xf32>
      tpu.vector_store %arg14[%c0_42, %c0_43], %56 {strides = array<i32>} : memref<128x128xf32, #tpu.memory_space<vmem>>, vector<128x128xf32>,
    } else {
    }
    %c0 = arith.constant 0 : index
    %c0_1 = arith.constant 0 : index
    %3 = vector.load %arg14[%c0, %c0_1] : memref<128x128xf32, #tpu.memory_space<vmem>>, vector<128x128xf32>
    %4 = arith.truncf %3 : vector<128x128xf32> to vector<128x128xbf16>
    %c0_2 = arith.constant 0 : index
    %c0_3 = arith.constant 0 : index
    %5 = vector.load %arg5[%c0_2, %c0_3] : memref<128x128xbf16, #tpu.memory_space<vmem>>, vector<128x128xbf16>
    %cst = arith.constant dense<0.000000e+00> : vector<128x128xf32>
    %6 = tpu.matmul %5, %4, %cst {dimension_numbers = #tpu.dot_dimension_numbers<[1], [0], [0], [1], [0, 0, 1, 1], [], []>} : vector<128x128xbf16>, vector<128x128xbf16>, vector<128x128xf32> -> vector<128x128xf32>
    %c0_4 = arith.constant 0 : index
    %c0_5 = arith.constant 0 : index
    %7 = vector.load %arg7[%c0_4, %c0_5] : memref<128x128xbf16, #tpu.memory_space<vmem>>, vector<128x128xbf16>
    %c0_6 = arith.constant 0 : index
    %c0_7 = arith.constant 0 : index
    %c0_8 = arith.constant 0 : index
    %8 = vector.load %arg8[%c0_6, %c0_7, %c0_8] : memref<1x128x128xbf16, #tpu.memory_space<vmem>>, vector<1x128x128xbf16>
    %9 = vector.shape_cast %8 : vector<1x128x128xbf16> to vector<128x128xbf16>
    %cst_9 = arith.constant dense<0.000000e+00> : vector<128x128xf32>
    %10 = tpu.matmul %7, %9, %cst_9 {dimension_numbers = #tpu.dot_dimension_numbers<[1], [0], [0], [1], [0, 0, 1, 1], [], []>} : vector<128x128xbf16>, vector<128x128xbf16>, vector<128x128xf32> -> vector<128x128xf32>
    %c0_10 = arith.constant 0 : index
    %c0_11 = arith.constant 0 : index
    %c0_12 = arith.constant 0 : index
    %11 = vector.load %arg9[%c0_10, %c0_11, %c0_12] : memref<1x1x128xf32, #tpu.memory_space<vmem>>, vector<1x1x128xf32>
    %12 = vector.shape_cast %11 : vector<1x1x128xf32> to vector<1x128xf32>
    %13 = vector.broadcast %12 : vector<1x128xf32> to vector<128x128xf32>
    %14 = arith.addf %10, %13 : vector<128x128xf32>
    %15 = arith.addf %6, %14 : vector<128x128xf32>
    %cst_13 = arith.constant 0.000000e+00 : f32
    %16 = vector.broadcast %cst_13 : f32 to vector<128x128xf32>
    %17 = arith.maximumf %15, %16 : vector<128x128xf32>
    %c0_14 = arith.constant 0 : index
    %c0_15 = arith.constant 0 : index
    %18 = vector.load %arg6[%c0_14, %c0_15] : memref<128x128xbf16, #tpu.memory_space<vmem>>, vector<128x128xbf16>
    %19 = arith.truncf %17 : vector<128x128xf32> to vector<128x128xbf16>
    %cst_16 = arith.constant dense<0.000000e+00> : vector<128x128xf32>
    %20 = tpu.matmul %18, %19, %cst_16 {dimension_numbers = #tpu.dot_dimension_numbers<[1], [0], [0], [1], [0, 0, 1, 1], [], []>} : vector<128x128xbf16>, vector<128x128xbf16>, vector<128x128xf32> -> vector<128x128xf32>
    %21 = arith.index_cast %arg0 : i32 to index
    %22 = memref.load %arg1[%21] : memref<2xf32, #tpu.memory_space<smem>>
    %cst_17 = arith.constant 1.000000e+00 : f32
    %23 = arith.addf %cst_17, %22 : f32
    %24 = vector.broadcast %23 : f32 to vector<128x128xf32>
    %25 = arith.mulf %24, %3 : vector<128x128xf32>
    %26 = arith.addf %25, %20 : vector<128x128xf32>
    %27 = arith.truncf %26 : vector<128x128xf32> to vector<128x128xbf16>
    %c0_18 = arith.constant 0 : index
    %c0_19 = arith.constant 0 : index
    %c0_20 = arith.constant 0 : index
    %28 = vector.load %arg10[%c0_18, %c0_19, %c0_20] : memref<1x128x128xbf16, #tpu.memory_space<vmem>>, vector<1x128x128xbf16>
    %29 = vector.shape_cast %28 : vector<1x128x128xbf16> to vector<128x128xbf16>
    %cst_21 = arith.constant dense<0.000000e+00> : vector<128x128xf32>
    %30 = tpu.matmul %27, %29, %cst_21 {dimension_numbers = #tpu.dot_dimension_numbers<[1], [0], [0], [1], [0, 0, 1, 1], [], []>} : vector<128x128xbf16>, vector<128x128xbf16>, vector<128x128xf32> -> vector<128x128xf32>
    %c0_22 = arith.constant 0 : index
    %c0_23 = arith.constant 0 : index
    %c0_24 = arith.constant 0 : index
    %31 = vector.load %arg11[%c0_22, %c0_23, %c0_24] : memref<1x1x128xf32, #tpu.memory_space<vmem>>, vector<1x1x128xf32>
    %32 = vector.shape_cast %31 : vector<1x1x128xf32> to vector<1x128xf32>
    %33 = vector.broadcast %32 : vector<1x128xf32> to vector<128x128xf32>
    %34 = arith.addf %30, %33 : vector<128x128xf32>
    %cst_25 = arith.constant 0.000000e+00 : f32
    %35 = vector.broadcast %cst_25 : f32 to vector<128x128xf32>
    %36 = arith.maximumf %34, %35 : vector<128x128xf32>
    %37 = arith.truncf %36 : vector<128x128xf32> to vector<128x128xbf16>
    %c0_26 = arith.constant 0 : index
    %c0_27 = arith.constant 0 : index
    %c0_28 = arith.constant 0 : index
    %38 = vector.load %arg12[%c0_26, %c0_27, %c0_28] : memref<1x128x128xbf16, #tpu.memory_space<vmem>>, vector<1x128x128xbf16>
    %39 = vector.shape_cast %38 : vector<1x128x128xbf16> to vector<128x128xbf16>
    %cst_29 = arith.constant dense<0.000000e+00> : vector<128x128xf32>
    %40 = tpu.matmul %37, %39, %cst_29 {dimension_numbers = #tpu.dot_dimension_numbers<[1], [0], [0], [1], [0, 0, 1, 1], [], []>} : vector<128x128xbf16>, vector<128x128xbf16>, vector<128x128xf32> -> vector<128x128xf32>
    %c0_30 = arith.constant 0 : index
    %c0_31 = arith.constant 0 : index
    %c0_32 = arith.constant 0 : index
    %41 = vector.load %arg13[%c0_30, %c0_31, %c0_32] : memref<1x1x128xf32, #tpu.memory_space<vmem>>, vector<1x1x128xf32>
    %42 = vector.shape_cast %41 : vector<1x1x128xf32> to vector<1x128xf32>
    %43 = vector.broadcast %42 : vector<1x128xf32> to vector<128x128xf32>
    %44 = arith.addf %40, %43 : vector<128x128xf32>
    %c1_i32 = arith.constant 1 : i32
    %45 = arith.cmpi eq, %arg0, %c1_i32 : i32
    %true = arith.constant true
    %46 = arith.xori %45, %true : i1
    %47 = arith.extui %46 : i1 to i32
    %c0_i32_33 = arith.constant 0 : i32
    %48 = arith.cmpi ne, %47, %c0_i32_33 : i32
    scf.if %48 {
      %cst_35 = arith.constant 0.000000e+00 : f32
      %51 = vector.broadcast %cst_35 : f32 to vector<128x128xf32>
      %52 = arith.maximumf %44, %51 : vector<128x128xf32>
      %c0_36 = arith.constant 0 : index
      %c0_37 = arith.constant 0 : index
      %53 = vector.load %arg14[%c0_36, %c0_37] : memref<128x128xf32, #tpu.memory_space<vmem>>, vector<128x128xf32>
      tpu.vector_store %arg14[%c0_36, %c0_37], %52 {strides = array<i32>} : memref<128x128xf32, #tpu.memory_space<vmem>>, vector<128x128xf32>,
    } else {
    }
    %49 = arith.extui %45 : i1 to i32
    %c0_i32_34 = arith.constant 0 : i32
    %50 = arith.cmpi ne, %49, %c0_i32_34 : i32
    scf.if %50 {
      %c0_35 = arith.constant 0 : index
      %c0_36 = arith.constant 0 : index
      %51 = vector.load %arg14[%c0_35, %c0_36] : memref<128x128xf32, #tpu.memory_space<vmem>>, vector<128x128xf32>
      tpu.vector_store %arg14[%c0_35, %c0_36], %44 {strides = array<i32>} : memref<128x128xf32, #tpu.memory_space<vmem>>, vector<128x128xf32>,
    } else {
    }
    return
  }
  func.func @transform_0(%arg0: i32) -> i32 {
    %c0_i32 = arith.constant 0 : i32
    %c0_i32_0 = arith.constant 0 : i32
    return %c0_i32 : i32
  }
  func.func @transform_1(%arg0: i32) -> (i32, i32) {
    %c0_i32 = arith.constant 0 : i32
    %c0_i32_0 = arith.constant 0 : i32
    %c0_i32_1 = arith.constant 0 : i32
    return %c0_i32, %c0_i32_0 : i32, i32
  }
  func.func @transform_2(%arg0: i32) -> (i32, i32) {
    %c0_i32 = arith.constant 0 : i32
    %c0_i32_0 = arith.constant 0 : i32
    %c0_i32_1 = arith.constant 0 : i32
    return %c0_i32, %c0_i32_0 : i32, i32
  }
  func.func @transform_3(%arg0: i32) -> (i32, i32) {
    %c0_i32 = arith.constant 0 : i32
    %c0_i32_0 = arith.constant 0 : i32
    %c0_i32_1 = arith.constant 0 : i32
    return %c0_i32, %c0_i32_0 : i32, i32
  }
  func.func @transform_4(%arg0: i32) -> (i32, i32) {
    %c0_i32 = arith.constant 0 : i32
    %c0_i32_0 = arith.constant 0 : i32
    %c0_i32_1 = arith.constant 0 : i32
    return %c0_i32, %c0_i32_0 : i32, i32
  }
  func.func @transform_5(%arg0: i32) -> (i32, i32) {
    %c0_i32 = arith.constant 0 : i32
    %c0_i32_0 = arith.constant 0 : i32
    %c0_i32_1 = arith.constant 0 : i32
    return %c0_i32, %c0_i32_0 : i32, i32
  }
  func.func @transform_6(%arg0: i32) -> (i32, i32) {
    %c0_i32 = arith.constant 0 : i32
    %c0_i32_0 = arith.constant 0 : i32
    %c0_i32_1 = arith.constant 0 : i32
    return %c0_i32, %c0_i32_0 : i32, i32
  }
  func.func @transform_7(%arg0: i32) -> (i32, i32, i32) {
    %c0_i32 = arith.constant 0 : i32
    %c0_i32_0 = arith.constant 0 : i32
    %c0_i32_1 = arith.constant 0 : i32
    return %arg0, %c0_i32, %c0_i32_0 : i32, i32, i32
  }
  func.func @transform_8(%arg0: i32) -> (i32, i32, i32) {
    %c0_i32 = arith.constant 0 : i32
    %c0_i32_0 = arith.constant 0 : i32
    %c0_i32_1 = arith.constant 0 : i32
    return %arg0, %c0_i32, %c0_i32_0 : i32, i32, i32
  }
  func.func @transform_9(%arg0: i32) -> (i32, i32, i32) {
    %c0_i32 = arith.constant 0 : i32
    %c0_i32_0 = arith.constant 0 : i32
    %c0_i32_1 = arith.constant 0 : i32
    return %arg0, %c0_i32, %c0_i32_0 : i32, i32, i32
  }
  func.func @transform_10(%arg0: i32) -> (i32, i32, i32) {
    %c0_i32 = arith.constant 0 : i32
    %c0_i32_0 = arith.constant 0 : i32
    %c0_i32_1 = arith.constant 0 : i32
    return %arg0, %c0_i32, %c0_i32_0 : i32, i32, i32
  }
  func.func @transform_11(%arg0: i32) -> (i32, i32, i32) {
    %c0_i32 = arith.constant 0 : i32
    %c0_i32_0 = arith.constant 0 : i32
    %c0_i32_1 = arith.constant 0 : i32
    return %arg0, %c0_i32, %c0_i32_0 : i32, i32, i32
  }
  func.func @transform_12(%arg0: i32) -> (i32, i32, i32) {
    %c0_i32 = arith.constant 0 : i32
    %c0_i32_0 = arith.constant 0 : i32
    %c0_i32_1 = arith.constant 0 : i32
    return %arg0, %c0_i32, %c0_i32_0 : i32, i32, i32
  }
  func.func @transform_13(%arg0: i32) -> (i32, i32) {
    %c0_i32 = arith.constant 0 : i32
    %c0_i32_0 = arith.constant 0 : i32
    %c0_i32_1 = arith.constant 0 : i32
    return %c0_i32, %c0_i32_0 : i32, i32
  }
}

</mosaic_0001>

<bundles_post_ra>
// kernel: tpu_custom_call.1
= control target key start
LH: loop header
LB: loop body
LE: loop exit
PB: predicated region body
PF: predicated region fallthrough
CT: control target
= control target key end

     0   :  { %s3768_s0 = inlined_call_operand.hbm [shape: f32[2], index: 0, kind: input, shape index: {}]   ;;  %s3769_s1 = inlined_call_operand.hbm [shape: bf16[128,128], index: 1, kind: input, shape index: {}]   ;;  %s3770_s2 = inlined_call_operand.hbm [shape: bf16[128,128], index: 2, kind: input, shape index: {}]   ;;  %s3771_s3 = inlined_call_operand.vmem [shape: f32[1,128], index: 3, kind: input, shape index: {}]   ;;  %s3772_s4 = inlined_call_operand.hbm [shape: bf16[128,128], index: 4, kind: input, shape index: {}]   ;;  %s3773_s5 = inlined_call_operand.hbm [shape: bf16[128,128], index: 5, kind: input, shape index: {}]   ;;  %s3774_s6 = inlined_call_operand.hbm [shape: bf16[128,128], index: 6, kind: input, shape index: {}]   ;;  %s3775_s7 = inlined_call_operand.hbm [shape: bf16[2,128,128], index: 7, kind: input, shape index: {}]   ;;  %s3776_s8 = inlined_call_operand.vmem [shape: f32[2,1,128], index: 8, kind: input, shape index: {}]   ;;  %s3777_s9 = inlined_call_operand.hbm [shape: bf16[2,128,128], index: 9, kind: input, shape index: {}]   ;;  %s3778_s10 = inlined_call_operand.vmem [shape: f32[2,1,128], index: 10, kind: input, shape index: {}]   ;;  %s3779_s11 = inlined_call_operand.hbm [shape: bf16[2,128,128], index: 11, kind: input, shape index: {}]   ;;  %s3780_s12 = inlined_call_operand.vmem [shape: f32[2,1,128], index: 12, kind: input, shape index: {}]   ;;  %s3781_s13 = inlined_call_operand.hbm [shape: f32[128,128], index: 13, kind: output, shape index: {}]  }
   0x1   :  { %3803 = sst [smem:[#allocation29_spill]] %s3768_s0 }
   0x2   :  { %3804 = sst [smem:[#allocation30_spill]] %s3770_s2 }
   0x3   :  { %3805 = sst [smem:[#allocation31_spill]] %s3771_s3 }
   0x4   :  { %3806 = sst [smem:[#allocation32_spill]] %s3773_s5 }
   0x5   :  { %3807 = sst [smem:[#allocation33_spill]] %s3775_s7 }
   0x6   :  { %3808 = sst [smem:[#allocation34_spill]] %s3776_s8 }
   0x7   :  { %3809 = sst [smem:[#allocation35_spill]] %s3778_s10 }
   0x8   :  { %3810 = sst [smem:[#allocation36_spill]] %s3780_s12 }
   0x9   :  { %3811 = sst [smem:[#allocation37_spill]] %s3781_s13 }
   0xa   :  { %18 = vsyncpa [#allocation5], 0 }
   0xb   :  { %19 = vsyncpa [#allocation3], 0 }
   0xc   :  { %20 = vsyncpa [#allocation8], 0 }
   0xd   :  { %21 = vsyncpa [#allocation11], 0 }
   0xe   :  { %22 = vsyncpa [#allocation14], 0 }
   0xf   :  { %24 = vsyncpa [#allocation14 + $0x1], 0 }
  0x10   :  { %25 = vsyncpa [#allocation17], 0 }
  0x11   :  { %27 = vsyncpa [#allocation17 + $0x1], 0 }
  0x12   :  { %28 = vsyncpa [#allocation4], 0  ;;  %s3212_s25 = smov 0   ;;  %s3214_s26 = smov 0  }
  0x13   :  { %s3216_s27 = smov 0   ;;  %s3218_s28 = smov 0  }
  0x14 LB: > { %s3233_s29 = sadd.s32 4294967295, %s3126_s28   ;;  %p2157_p0 = scmp.ge.s32.totalorder %s3126_s28, 1  ;;  %s3126_s28 = sphi %s3218_s28, %s3853_s28   ;;  %s3122_s27 = sphi %s3216_s27, %s3857_s27   ;;  %s3118_s26 = sphi %s3214_s26, %s3856_s26   ;;  %s3114_s25 = sphi %s3212_s25, %s3855_s25  }
  0x15   : > { %p3782_p1 = scmp.eq.s32.totalorder %s3233_s29, 0  ;;  %p363_p2 = scmp.lt.s32.totalorder %s3126_s28, 3 }
  0x16   : > { %s3128_s14 = smov [#allocation7]   ;;  %s3129_s16 = smov [#allocation10]  }
  0x17   : > { %p3239_p4 = pnand %p2157_p0, %p363_p2  ;;  %s397_s15 = sshll.u32 %s3128_s14, 4  ;;  %s398_s15 = int_to_ptr.vmem [resolvable:$true] %s397_s15 }
  0x18   : > { %s426_s17 = sshll.u32 %s3129_s16, 4  ;;  %s3814_s2 = sld [smem:[#allocation30_spill]]  ;;  %s3251_s17 = int_to_ptr.vmem [resolvable:$true] %s426_s17 }
  0x19   : > { %s3812_s30 = scalar_select %p3239_p4, 1, 0 }
  0x1a   : > { %p2648_p5 = pneg %p3239_p4 }
  0x1c   : > { %p3247_p6 = pnand %p2648_p5, %p3782_p1 }
  0x1e   : > { %s3813_s18 = scalar_select %p3247_p6, 1, 0 }
  0x1f   : > { %s2799_s21 = scalar_lea.hbm %s3814_s2, 1024  ;;  %p3261_p8 = pneg %p3247_p6 }
  0x20   : > { %p2800_p7 = scmp.ne.s32.totalorder %s3814_s2, %s2799_s21  ;;  %p2806_p11 = scmp.lt.u32.totalorder %s2799_s21, %s3814_s2 }
  0x21   : > { %s3815_s24 = scalar_select %p3261_p8, 1, 0 }
  0x22   : > { %p2802_p9 = pnand %p3261_p8, %p2800_p7 }
  0x24   : > { %p2803_p10 = pneg %p2802_p9 }
  0x26   : > { %p2808_p12 = pnand %p2806_p11, %p2803_p10 }
  0x28   : > { %2811 = shalt.err (!%p2808_p12)
}
  0x29   : > { %s2812_s19 = scalar_lea.vmem %s398_s15, 1024  ;;  %p2820_p5 = scmp.lt.s32.totalorder %s398_s15, %s398_s15 }
  0x2a   : > { %p2813_p13 = scmp.ne.s32.totalorder %s398_s15, %s2812_s19  ;;  %p2821_p3 = scmp.lt.s32.totalorder %s2812_s19, %s2812_s19 }
  0x2c   : > { %p2815_p0 = pnand %p2813_p13, %p3261_p8  ;;  %p2822_p1 = por %p2821_p3, %p2820_p5 }
  0x2e   : > { %p2816_p2 = pneg %p2815_p0 }
  0x30   : > { %p2823_p4 = pnand %p2822_p1, %p2816_p2 }
  0x32   : > { %2826 = shalt.err (!%p2823_p4)
}
  0x33   : > { %s3786_s20 = smov 64   ;;  %s3788_s22 = smov 4  }
  0x34   : > { %2657 = dma.hbm_to_vmem [thread:$0]  (!%p3247_p6), %s3814_s2, 1024, %s398_s15, [#allocation8], %s3786_s20, %s3786_s20, %s3788_s22  }
  0x35   : > { %s3816_s5 = sld [smem:[#allocation32_spill]] }
  0x3b   : > { %s2827_s13 = scalar_lea.hbm %s3816_s5, 1024 }
  0x3c   : > { %p2828_p1 = scmp.ne.s32.totalorder %s3816_s5, %s2827_s13  ;;  %p2834_p7 = scmp.lt.u32.totalorder %s2827_s13, %s3816_s5 }
  0x3e   : > { %p2830_p3 = pnand %p2828_p1, %p3261_p8 }
  0x40   : > { %p2831_p4 = pneg %p2830_p3 }
  0x42   : > { %p2836_p9 = pnand %p2834_p7, %p2831_p4 }
  0x44   : > { %2839 = shalt.err (!%p2836_p9)
}
  0x45   : > { %s2840_s15 = scalar_lea.vmem %s3251_s17, 1024  ;;  %p2848_p13 = scmp.lt.s32.totalorder %s3251_s17, %s3251_s17 }
  0x46   : > { %p2841_p10 = scmp.ne.s32.totalorder %s3251_s17, %s2840_s15  ;;  %p2849_p0 = scmp.lt.s32.totalorder %s2840_s15, %s2840_s15 }
  0x48   : > { %p2843_p11 = pnand %p2841_p10, %p3261_p8  ;;  %p2850_p2 = por %p2849_p0, %p2848_p13 }
  0x4a   : > { %p2844_p12 = pneg %p2843_p11 }
  0x4c   : > { %p2851_p5 = pnand %p2850_p2, %p2844_p12 }
  0x4e   : > { %2854 = shalt.err (!%p2851_p5)
}
  0x4f   : > { %2663 = dma.hbm_to_vmem [thread:$0]  (!%p3247_p6), %s3816_s5, 1024, %s3251_s17, [#allocation11], %s3786_s20, %s3786_s20, %s3788_s22  }
  0x50   : > { %s3307_s12 = sadd.s32 1, %s3126_s28   ;;  %s188_s13 = sadd.s32 1, %s3122_s27 }
  0x51   : > { %3817 = sst [smem:[#allocation26_spill]] %s3307_s12  ;;  %s185_s21 = ssub.s32 %s3126_s28, %s3307_s12 }
  0x52   : > { %p195_p1 = scmp.ne.s32.totalorder %s3122_s27, %s3118_s26  ;;  %p186_p3 = scmp.eq.s32.totalorder %s185_s21, 0 }
  0x53   : > { %p196_p4 = scmp.eq.s32.totalorder %s3126_s28, 0  ;;  %p201_p7 = scmp.ne.s32.totalorder %s3118_s26, %s3114_s25 }
  0x54   : > { %p2683_p9 = scmp.lt.s32.totalorder %s3126_s28, 2  ;;  %p3819_p11 = scmp.eq.s32.totalorder %s3233_s29, 0 }
  0x55   : > { %s3319_s23 = scalar_select %p186_p3, %s3122_s27, %s188_s13  }
  0x56   : > { %p197_p10 = por %p196_p4, %p195_p1  ;;  %p3323_p12 = por %p3819_p11, %p201_p7 }
  0x57   : > { %3818 = sst [smem:[#allocation27_spill]] %s3319_s23  ;;  %s453_s16 = sand.u32 1, %s3126_s28  }
  0x58   : > { %s3820_s14 = scalar_select %p3323_p12, 1, 0 }
  0x59   : > { %s3785_s17 = sand.u32 1, %s3122_s27   ;;  %s3334_s15 = sshll.u32 %s3126_s28, 10 }
  0x5a   : > { %3821 = sst [smem:[#allocation28_spill]] %s3820_s14  ;;  %s3331_s19 = sshll.u32 %s3785_s17, 6 }
  0x5b   : > { %s3822_s7 = sld [smem:[#allocation33_spill]]  ;;  %s457_s13 = scalar_lea.vmem [#allocation13], %s3331_s19 }
  0x5c   : > { %s464_s21 = sshll.u32 %s457_s13, 4  ;;  %p3345_p13 = pnand %p2683_p9, %p197_p10  ;;  %s3343_s21 = int_to_ptr.vmem [resolvable:$true] %s464_s21 }
  0x5d   : > { %s3132_s28 = smov [#allocation6]   ;;  %s3351_s22 = scalar_lea.sflag [#allocation14], %s453_s16 }
  0x5e   : > { %s3823_s17 = scalar_select %p3345_p13, 1, 0 }
  0x5f   : > { %s3349_s20 = sshll.u32 %s3132_s28, 4  ;;  %p3357_p2 = pneg %p3345_p13  ;;  %s385_s20 = int_to_ptr.vmem [resolvable:$true] %s3349_s20 }
  0x61   : > { %s3340_s10 = scalar_lea.hbm %s3822_s7, %s3334_s15  ;;  %s2860_s5 = scalar_lea.hbm %s3822_s7, 2048 }
  0x62   : > { %s2855_s3 = scalar_lea.hbm %s3340_s10, 1024  ;;  %p2861_p3 = scmp.lt.u32.totalorder %s3340_s10, %s3822_s7 }
  0x63   : > { %p2856_p0 = scmp.ne.s32.totalorder %s3340_s10, %s2855_s3  ;;  %p2862_p4 = scmp.lt.u32.totalorder %s2860_s5, %s2855_s3 }
  0x64   : > { %s3824_s25 = scalar_select %p3357_p2, 1, 0 }
  0x65   : > { %p2858_p5 = pnand %p3357_p2, %p2856_p0  ;;  %p2863_p7 = por %p2862_p4, %p2861_p3 }
  0x66   : > { %p2864_p9 = scmp.lt.u32.totalorder %s2855_s3, %s3340_s10 }
  0x67   : > { %p2859_p1 = pneg %p2858_p5 }
  0x68   : > { %p2865_p10 = por %p2864_p9, %p2863_p7 }
  0x6a   : > { %p2866_p11 = pnand %p2865_p10, %p2859_p1 }
  0x6c   : > { %2869 = shalt.err (!%p2866_p11)
}
  0x6d   : > { %s2870_s16 = scalar_lea.vmem %s3343_s21, 1024  ;;  %s3133_s2 = smov [#allocation13]  }
  0x6e   : > { %p2871_p0 = scmp.ne.s32.totalorder %s3343_s21, %s2870_s16  ;;  %s2875_s13 = sshll.u32 %s3133_s2, 4  ;;  %s2876_s13 = int_to_ptr.vmem [resolvable:$false] %s2875_s13 }
  0x6f   : > { %s2877_s23 = scalar_lea.vmem %s2876_s13, 2048  ;;  %p2878_p6 = scmp.lt.s32.totalorder %s3343_s21, %s2876_s13 }
  0x70   : > { %p2873_p5 = pnand %p2871_p0, %p3357_p2  ;;  %p2879_p8 = scmp.lt.s32.totalorder %s2877_s23, %s2870_s16 }
  0x72   : > { %p2874_p12 = pneg %p2873_p5  ;;  %p2880_p3 = por %p2879_p8, %p2878_p6 }
  0x74   : > { %p2881_p4 = pnand %p2880_p3, %p2874_p12 }
  0x76   : > { %2884 = shalt.err (!%p2881_p4)
}
  0x77   : > { %s3825_s5 = smov 4   ;;  %s3826_s3 = smov 64  }
  0x78   : > { %2670 = dma.hbm_to_vmem [thread:$0]  (!%p3345_p13), %s3340_s10, 1024, %s3343_s21, %s3351_s22, %s3826_s3, %s3826_s3, %s3825_s5  }
  0x79   : > { %s3827_s0 = sld [smem:[#allocation29_spill]]  ;;  %p3828_p8 = scmp.ne.s32.totalorder %s3815_s24, 0 }
  0x7f   : > { %s2885_s2 = scalar_lea.hbm %s3827_s0, 16 }
  0x80   : > { %p2886_p6 = scmp.ne.s32.totalorder %s3827_s0, %s2885_s2  ;;  %p2892_p7 = scmp.lt.u32.totalorder %s2885_s2, %s3827_s0 }
  0x82   : > { %p2888_p12 = pnand %p2886_p6, %p3828_p8 }
  0x84   : > { %p2889_p1 = pneg %p2888_p12 }
  0x86   : > { %p2894_p9 = pnand %p2892_p7, %p2889_p1 }
  0x88   : > { %2897 = shalt.err (!%p2894_p9)
}
  0x89   : > { %s3134_s8 = smov [#allocation2]   ;;  %p3829_p10 = scmp.ne.s32.totalorder %s3813_s18, 0 }
  0x8a   : > { %s2898_s28 = scalar_lea.hbm %s3769_s1, 1024 }
  0x8b   : > { %2651 = dma.hbm_to_smem (!%p3829_p10), %s3827_s0, 16, %s3134_s8, [#allocation5]  }
  0x8c   : > { %p2899_p11 = scmp.ne.s32.totalorder %s3769_s1, %s2898_s28  ;;  %p2905_p3 = scmp.lt.u32.totalorder %s2898_s28, %s3769_s1 }
  0x8e   : > { %p2901_p0 = pnand %p2899_p11, %p3828_p8 }
  0x90   : > { %p2902_p5 = pneg %p2901_p0 }
  0x92   : > { %p2907_p4 = pnand %p2905_p3, %p2902_p5 }
  0x94   : > { %2910 = shalt.err (!%p2907_p4)
}
  0x95   : > { %s2911_s23 = scalar_lea.vmem %s385_s20, 1024  ;;  %p2919_p7 = scmp.lt.s32.totalorder %s385_s20, %s385_s20 }
  0x96   : > { %p2912_p6 = scmp.ne.s32.totalorder %s385_s20, %s2911_s23  ;;  %p2920_p9 = scmp.lt.s32.totalorder %s2911_s23, %s2911_s23 }
  0x98   : > { %p2914_p12 = pnand %p2912_p6, %p3828_p8  ;;  %p2921_p13 = por %p2920_p9, %p2919_p7 }
  0x9a   : > { %p2915_p1 = pneg %p2914_p12 }
  0x9c   : > { %p2922_p2 = pnand %p2921_p13, %p2915_p1 }
  0x9e   : > { %2925 = shalt.err (!%p2922_p2)
}
  0x9f   : > { %2654 = dma.hbm_to_vmem [thread:$0]  (!%p3829_p10), %s3769_s1, 1024, %s385_s20, [#allocation3], %s3826_s3, %s3826_s3, %s3825_s5  }
  0xa0   : > { %s3135_s10 = smov [#allocation9]   ;;  %s3136_s7 = smov [#allocation12]  }
  0xa1   : > { %s413_s21 = sshll.u32 %s3135_s10, 4  ;;  %s439_s12 = sshll.u32 %s3136_s7, 4  ;;  %s414_s21 = int_to_ptr.vmem [resolvable:$true] %s413_s21  ;;  %s440_s12 = int_to_ptr.vmem [resolvable:$true] %s439_s12 }
  0xa2   : > { %s2926_s2 = scalar_lea.hbm %s3772_s4, 1024 }
  0xa3   : > { %p2927_p13 = scmp.ne.s32.totalorder %s3772_s4, %s2926_s2  ;;  %p2933_p0 = scmp.lt.u32.totalorder %s2926_s2, %s3772_s4 }
  0xa5   : > { %p2929_p2 = pnand %p2927_p13, %p3828_p8 }
  0xa7   : > { %p2930_p11 = pneg %p2929_p2 }
  0xa9   : > { %p2935_p5 = pnand %p2933_p0, %p2930_p11 }
  0xab   : > { %2938 = shalt.err (!%p2935_p5)
}
  0xac   : > { %s2939_s20 = scalar_lea.vmem %s414_s21, 1024  ;;  %p2947_p12 = scmp.lt.s32.totalorder %s414_s21, %s414_s21 }
  0xad   : > { %p2940_p3 = scmp.ne.s32.totalorder %s414_s21, %s2939_s20  ;;  %p2948_p1 = scmp.lt.s32.totalorder %s2939_s20, %s2939_s20 }
  0xaf   : > { %p2942_p4 = pnand %p2940_p3, %p3828_p8  ;;  %p2949_p7 = por %p2948_p1, %p2947_p12 }
  0xb1   : > { %p2943_p6 = pneg %p2942_p4 }
  0xb3   : > { %p2950_p9 = pnand %p2949_p7, %p2943_p6 }
  0xb5   : > { %2953 = shalt.err (!%p2950_p9)
}
  0xb6   : > { %2660 = dma.hbm_to_vmem [thread:$0]  (!%p3829_p10), %s3772_s4, 1024, %s414_s21, [#allocation8], %s3826_s3, %s3826_s3, %s3825_s5  }
  0xb7   : > { %s2954_s28 = scalar_lea.hbm %s3774_s6, 1024 }
  0xb8   : > { %p2955_p13 = scmp.ne.s32.totalorder %s3774_s6, %s2954_s28  ;;  %p2961_p0 = scmp.lt.u32.totalorder %s2954_s28, %s3774_s6 }
  0xba   : > { %p2957_p2 = pnand %p2955_p13, %p3828_p8 }
  0xbc   : > { %p2958_p11 = pneg %p2957_p2 }
  0xbe   : > { %p2963_p5 = pnand %p2961_p0, %p2958_p11 }
  0xc0   : > { %2966 = shalt.err (!%p2963_p5)
}
  0xc1   : > { %s2967_s8 = scalar_lea.vmem %s440_s12, 1024  ;;  %p2975_p12 = scmp.lt.s32.totalorder %s440_s12, %s440_s12 }
  0xc2   : > { %p2968_p3 = scmp.ne.s32.totalorder %s440_s12, %s2967_s8  ;;  %p2976_p1 = scmp.lt.s32.totalorder %s2967_s8, %s2967_s8 }
  0xc4   : > { %p2970_p4 = pnand %p2968_p3, %p3828_p8  ;;  %p2977_p7 = por %p2976_p1, %p2975_p12 }
  0xc6   : > { %p2971_p6 = pneg %p2970_p4 }
  0xc8   : > { %p2978_p9 = pnand %p2977_p7, %p2971_p6 }
  0xca   : > { %2981 = shalt.err (!%p2978_p9)
}
  0xcb   : > { %2666 = dma.hbm_to_vmem [thread:$0]  (!%p3829_p10), %s3774_s6, 1024, %s440_s12, [#allocation11], %s3826_s3, %s3826_s3, %s3825_s5  }
  0xcc   : > { %s3468_s14 = scalar_lea.hbm %s3777_s9, %s3334_s15  ;;  %s484_s18 = scalar_lea.vmem [#allocation15], %s3331_s19 }
  0xcd   : > { %s491_s10 = sshll.u32 %s484_s18, 4  ;;  %s2982_s7 = scalar_lea.hbm %s3468_s14, 1024  ;;  %s3471_s10 = int_to_ptr.vmem [resolvable:$true] %s491_s10 }
  0xce   : > { %p2983_p8 = scmp.ne.s32.totalorder %s3468_s14, %s2982_s7  ;;  %p3830_p13 = scmp.ne.s32.totalorder %s3824_s25, 0 }
  0xcf   : > { %s2987_s13 = scalar_lea.hbm %s3777_s9, 2048  ;;  %p2988_p10 = scmp.lt.u32.totalorder %s3468_s14, %s3777_s9 }
  0xd0   : > { %p2985_p2 = pnand %p2983_p8, %p3830_p13  ;;  %p2989_p0 = scmp.lt.u32.totalorder %s2987_s13, %s2982_s7 }
  0xd1   : > { %p2991_p3 = scmp.lt.u32.totalorder %s2982_s7, %s3468_s14 }
  0xd2   : > { %p2986_p11 = pneg %p2985_p2  ;;  %p2990_p5 = por %p2989_p0, %p2988_p10 }
  0xd4   : > { %p2992_p4 = por %p2991_p3, %p2990_p5 }
  0xd6   : > { %p2993_p6 = pnand %p2992_p4, %p2986_p11 }
  0xd8   : > { %2996 = shalt.err (!%p2993_p6)
}
  0xd9   : > { %s2997_s23 = scalar_lea.vmem %s3471_s10, 1024  ;;  %s3137_s8 = smov [#allocation15]  }
  0xda   : > { %p2998_p12 = scmp.ne.s32.totalorder %s3471_s10, %s2997_s23  ;;  %s3002_s21 = sshll.u32 %s3137_s8, 4  ;;  %s3003_s21 = int_to_ptr.vmem [resolvable:$false] %s3002_s21 }
  0xdb   : > { %s3004_s20 = scalar_lea.vmem %s3003_s21, 2048  ;;  %p3005_p9 = scmp.lt.s32.totalorder %s3471_s10, %s3003_s21 }
  0xdc   : > { %p3000_p1 = pnand %p2998_p12, %p3830_p13  ;;  %p3006_p8 = scmp.lt.s32.totalorder %s3004_s20, %s2997_s23 }
  0xde   : > { %p3001_p7 = pneg %p3000_p1  ;;  %p3007_p2 = por %p3006_p8, %p3005_p9 }
  0xe0   : > { %p3008_p10 = pnand %p3007_p2, %p3001_p7 }
  0xe2   : > { %3011 = shalt.err (!%p3008_p10)
}
  0xe3   : > { %p3831_p11 = scmp.ne.s32.totalorder %s3823_s17, 0  ;;  %s3502_s18 = scalar_lea.hbm %s3779_s11, %s3334_s15 }
  0xe4   : > { %s511_s7 = scalar_lea.vmem [#allocation16], %s3331_s19  ;;  %s3832_s12 = sand.u32 1, %s3122_s27  }
  0xe5   : > { %2673 = dma.hbm_to_vmem [thread:$0]  (!%p3831_p11), %s3468_s14, 1024, %s3471_s10, %s3351_s22, %s3826_s3, %s3826_s3, %s3825_s5  }
  0xe6   : > { %s518_s28 = sshll.u32 %s511_s7, 4  ;;  %s3509_s13 = scalar_lea.sflag [#allocation17], %s3832_s12  ;;  %s3505_s28 = int_to_ptr.vmem [resolvable:$true] %s518_s28 }
  0xe7   : > { %s3012_s2 = scalar_lea.hbm %s3502_s18, 1024  ;;  %s3017_s15 = scalar_lea.hbm %s3779_s11, 2048 }
  0xe8   : > { %p3013_p0 = scmp.ne.s32.totalorder %s3502_s18, %s3012_s2  ;;  %p3018_p4 = scmp.lt.u32.totalorder %s3502_s18, %s3779_s11 }
  0xe9   : > { %p3019_p6 = scmp.lt.u32.totalorder %s3017_s15, %s3012_s2  ;;  %p3021_p1 = scmp.lt.u32.totalorder %s3012_s2, %s3502_s18 }
  0xea   : > { %p3015_p5 = pnand %p3013_p0, %p3830_p13 }
  0xeb   : > { %p3020_p12 = por %p3019_p6, %p3018_p4 }
  0xec   : > { %p3016_p3 = pneg %p3015_p5 }
  0xed   : > { %p3022_p7 = por %p3021_p1, %p3020_p12 }
  0xef   : > { %p3023_p9 = pnand %p3022_p7, %p3016_p3 }
  0xf1   : > { %3026 = shalt.err (!%p3023_p9)
}
  0xf2   : > { %s3027_s19 = scalar_lea.vmem %s3505_s28, 1024  ;;  %s3138_s23 = smov [#allocation16]  }
  0xf3   : > { %p3028_p8 = scmp.ne.s32.totalorder %s3505_s28, %s3027_s19  ;;  %s3032_s8 = sshll.u32 %s3138_s23, 4  ;;  %s3033_s8 = int_to_ptr.vmem [resolvable:$false] %s3032_s8 }
  0xf4   : > { %s3034_s21 = scalar_lea.vmem %s3033_s8, 2048  ;;  %p3035_p0 = scmp.lt.s32.totalorder %s3505_s28, %s3033_s8 }
  0xf5   : > { %p3030_p2 = pnand %p3028_p8, %p3830_p13  ;;  %p3036_p5 = scmp.lt.s32.totalorder %s3034_s21, %s3027_s19 }
  0xf7   : > { %p3031_p10 = pneg %p3030_p2  ;;  %p3037_p4 = por %p3036_p5, %p3035_p0 }
  0xf9   : > { %p3038_p6 = pnand %p3037_p4, %p3031_p10 }
  0xfb   : > { %3041 = shalt.err (!%p3038_p6)
}
  0xfc   : > { %2676 = dma.hbm_to_vmem [thread:$0]  (!%p3831_p11), %s3502_s18, 1024, %s3505_s28, %s3509_s13, %s3826_s3, %s3826_s3, %s3825_s5  }
  0xfd   : > { %p3833_p13 = scmp.ne.s32.totalorder %s3812_s30, 0 }
  0xfe   : > { %p3834_p3 = scmp.eq.s32.totalorder (!%p3833_p13), %s3233_s29, 0 }
  0xff   : > { %536 = sbr.rel (%p3833_p13) target bundleno = 1594 (0x63a), region = 72 }
 0x106   : > { %3085 = dma.done.wait (%p3834_p3), [#allocation5], 16   ;;  %p3835_p12 = pmov %p3834_p3 }
 0x107   : > { %p3836_p1 = pmov %p3834_p3 }
 0x108   : > { %3087 = vsyncadd (%p3835_p12), [#allocation5], 4294967280 }
 0x109   : > { %3089 = dma.done.wait (%p3836_p1), [#allocation3], 1024   ;;  %p3837_p7 = pmov %p3836_p1 }
 0x10a   : > { %p3838_p9 = pmov %p3836_p1 }
 0x10b   : > { %3091 = vsyncadd (%p3837_p7), [#allocation3], 4294966272 }
 0x10c   : > { %3093 = dma.done.wait (%p3838_p9), [#allocation8], 2048   ;;  %p3839_p11 = pmov %p3836_p1 }
 0x10d   : > { %p3840_p8 = pmov %p3836_p1 }
 0x10e   : > { %3095 = vsyncadd (%p3839_p11), [#allocation8], 4294965248 }
 0x10f   : > { %3097 = dma.done.wait (%p3840_p8), [#allocation11], 2048   ;;  %p3841_p2 = pmov %p3836_p1 }
 0x110   : > { %s3842_s30 = sld [smem:[#allocation28_spill]]  ;;  %s562_s17 = sand.u32 1, %s3233_s29  }
 0x111   : > { %3099 = vsyncadd (%p3841_p2), [#allocation11], 4294965248  ;;  %s564_s25 = sand.u32 1, %s3118_s26   ;;  %s563_s3 = scalar_lea.sflag [#allocation14], %s562_s17 }
 0x112   : > { %s2181_s5 = sshll.u32 %s564_s25, 6 }
 0x113   : > { %s3556_s20 = scalar_lea.vmem [#allocation13], %s2181_s5 }
 0x116   : > { %p3843_p10 = scmp.ne.s32.totalorder %s3842_s30, 0 }
 0x118   : > { %3101 = dma.done.wait (%p3843_p10), %s563_s3, 2048  }
 0x119   : > { %3103 = vsyncadd (%p3843_p10), %s563_s3, 4294965248  ;;  %s3562_s24 = scalar_lea.vmem [#allocation15], %s2181_s5  ;;  %s581_s0 = scalar_lea.sflag [#allocation17], %s564_s25 }
 0x11a   : > { %s3564_s18 = scalar_lea.vmem [#allocation16], %s2181_s5 }
 0x11b   : > { %3105 = dma.done.wait (%p3843_p10), %s581_s0, 1024  }
 0x11c   : > { %3107 = vsyncadd (%p3843_p10), %s581_s0, 4294966272 }
 0x11d   : > { %589 = sfence }
 0x11e   : > { %p642_p0 = scmp.lt.s32.totalorder %s3233_s29, 1  ;;  %s3844_s13 = sld [smem:[#allocation34_spill]] }
 0x11f   : > { %s3845_s15 = sld [smem:[#allocation35_spill]]  ;;  %s3846_s23 = sld [smem:[#allocation36_spill]] }
 0x120   : > { %s3572_s7 = scalar_select %p642_p0, %s3233_s29, 1 }
 0x121   : > { %p3847_p5 = scmp.ne.s32.totalorder %s3233_s29, 0 }
 0x122   : > { %v2735_v0 = vld [vmem:[#allocation7] sm:$0xff] (!%p3847_p5)   ;;  %v2736_v1 = vld [vmem:[#allocation7 + $0x8] sm:$0xff] (!%p3847_p5)   ;;  %v2737_v2 = vld [vmem:[#allocation7 + $0x10] sm:$0xff] (!%p3847_p5)   ;;  %s3848_s17 = sld [smem:[#allocation31_spill]] (!%p3847_p5) }
 0x123   : > { %655 = sbr.rel (%p3847_p5) target bundleno = 549 (0x225), region = 112  ;;  %2358 = vmatprep.subr.bf16.mxu0 (!%p3847_p5), %v2735_v0  ;;  %2550 = vmatprep.subr.bf16.mxu1 (!%p3847_p5), %v2735_v0  ;;  %v2738_v3 = vld [vmem:[#allocation7 + $0x18] sm:$0xff] (!%p3847_p5)   ;;  %v2743_v4 = vld [vmem:[#allocation6] sm:$0xff] (!%p3847_p5)   ;;  %v2740_v7 = vld [vmem:[#allocation7 + $0x28] sm:$0xff] (!%p3847_p5)  }
 0x124   : > { %s644_s2 = scalar_lea.vmem %s3844_s13, %s3572_s7  ;;  %2359 = vmatpush3.bf16.msra.mxu0 (!%p3847_p5), %v2735_v0  ;;  %2558 = vmatpush3.bf16.msra.mxu1 (!%p3847_p5), %v2735_v0  ;;  %v2744_v5 = vld [vmem:[#allocation6 + $0x20] sm:$0xff] (!%p3847_p5)   ;;  %v2741_v8 = vld [vmem:[#allocation7 + $0x30] sm:$0xff] (!%p3847_p5)   ;;  %v2742_v9 = vld [vmem:[#allocation7 + $0x38] sm:$0xff] (!%p3847_p5)  }
 0x125   : > { %s647_s10 = scalar_lea.vmem %s3845_s15, %s3572_s7  ;;  %s650_s8 = scalar_lea.vmem %s3846_s23, %s3572_s7  ;;  %2360 = vmatprep.subr.bf16.mxu0 (!%p3847_p5), %v2736_v1  ;;  %2551 = vmatprep.subr.bf16.mxu1 (!%p3847_p5), %v2736_v1  ;;  %v2739_v6 = vld [vmem:[#allocation7 + $0x20] sm:$0xff] (!%p3847_p5)   ;;  %v2745_v10 = vld [vmem:[#allocation6 + $0x8] sm:$0xff] (!%p3847_p5)   ;;  %v2747_v12 = vld [vmem:[#allocation6 + $0x10] sm:$0xff] (!%p3847_p5)  }
 0x126   : > { %2374 = vmatprep.mubr.bf16.mxu0 (!%p3847_p5), %v2743_v4  ;;  %2382 = vmatprep.mubr.bf16.mxu1 (!%p3847_p5), %v2744_v5  ;;  %v2746_v11 = vld [vmem:[#allocation6 + $0x28] sm:$0xff] (!%p3847_p5)   ;;  %v2748_v13 = vld [vmem:[#allocation6 + $0x30] sm:$0xff] (!%p3847_p5)   ;;  %v2749_v14 = vld [vmem:[#allocation6 + $0x18] sm:$0xff] (!%p3847_p5)  }
 0x127   : > { %v2750_v15 = vld [vmem:[#allocation6 + $0x38] sm:$0xff] (!%p3847_p5)  }
 0x128   : > { %2361 = vmatpush3.bf16.msra.mxu0 (!%p3847_p5), %v2736_v1  ;;  %2559 = vmatpush3.bf16.msra.mxu1 (!%p3847_p5), %v2736_v1  ;;  %v2185_v16 = vld [vmem:[%s3848_s17] ss:$0 sm:$0xff] (!%p3847_p5) }
 0x129   : > { %2362 = vmatprep.subr.bf16.mxu0 (!%p3847_p5), %v2737_v2  ;;  %2552 = vmatprep.subr.bf16.mxu1 (!%p3847_p5), %v2737_v2 }
 0x12c   : > { %2363 = vmatpush3.bf16.msra.mxu0 %v2737_v2  ;;  %2560 = vmatpush3.bf16.msra.mxu1 %v2737_v2 }
 0x12d   : > { %2364 = vmatprep.subr.bf16.mxu0 %v2738_v3  ;;  %2553 = vmatprep.subr.bf16.mxu1 %v2738_v3 }
 0x130   : > { %2365 = vmatpush3.bf16.msra.mxu0 %v2738_v3  ;;  %2561 = vmatpush3.bf16.msra.mxu1 %v2738_v3 }
 0x131   : > { %2366 = vmatprep.subr.bf16.mxu0 %v2739_v6  ;;  %2554 = vmatprep.subr.bf16.mxu1 %v2739_v6 }
 0x134   : > { %2367 = vmatpush3.bf16.msra.mxu0 %v2739_v6  ;;  %2562 = vmatpush3.bf16.msra.mxu1 %v2739_v6 }
 0x135   : > { %2368 = vmatprep.subr.bf16.mxu0 %v2740_v7  ;;  %2555 = vmatprep.subr.bf16.mxu1 %v2740_v7 }
 0x138   : > { %2369 = vmatpush3.bf16.msra.mxu0 %v2740_v7  ;;  %2563 = vmatpush3.bf16.msra.mxu1 %v2740_v7 }
 0x139   : > { %2370 = vmatprep.subr.bf16.mxu0 %v2741_v8  ;;  %2556 = vmatprep.subr.bf16.mxu1 %v2741_v8 }
 0x13c   : > { %2371 = vmatpush3.bf16.msra.mxu0 %v2741_v8  ;;  %2564 = vmatpush3.bf16.msra.mxu1 %v2741_v8 }
 0x13d   : > { %2372 = vmatprep.subr.bf16.mxu0 %v2742_v9  ;;  %2557 = vmatprep.subr.bf16.mxu1 %v2742_v9 }
 0x140   : > { %2373 = vmatpush3.bf16.msra.mxu0 %v2742_v9  ;;  %2565 = vmatpush3.bf16.msra.mxu1 %v2742_v9 }
 0x143   : > { %2375 = vmatmul.mubr.bf16.vlgmr.msra.gmra.mrb[0].mxu0 %v2745_v10  ;;  %2383 = vmatmul.mubr.bf16.vlgmr.msra.gmra.mrb[0].mxu1 %v2746_v11 }
 0x144   : > { %2378 = vmatprep.mubr.bf16.mxu0 %v2747_v12  ;;  %2386 = vmatprep.mubr.bf16.mxu1 %v2748_v13 }
 0x14b   : > { %2379 = vmatmul.mubr.bf16.gmra.mrb[4].mxu0 %v2749_v14  ;;  %2387 = vmatmul.mubr.bf16.gmra.mrb[4].mxu1 %v2750_v15 }
 0x216   : > { %v2376_v17 = vpop.f32.mrb[0].mxu0  ;;  %v2384_v18 = vpop.f32.mrb[0].mxu1 }
 0x217   : > { %v834_v19 = vadd.f32 %v2376_v17, %v2185_v16  ;;  %v866_v20 = vadd.f32 %v2384_v18, %v2185_v16  ;;  %v825_v21 = vpop.f32.mrb[1].mxu0  ;;  %v857_v22 = vpop.f32.mrb[1].mxu1 }
 0x218   : > { %v826_v23 = vadd.f32 %v2185_v16, %v825_v21  ;;  %v858_v24 = vadd.f32 %v2185_v16, %v857_v22  ;;  %v2377_v25 = vpop.f32.mrb[2].mxu0  ;;  %v2385_v26 = vpop.f32.mrb[2].mxu1 }
 0x219   : > { %890 = vst [vmem:[#allocation18 + $0x10] sm:$0xff] %v834_v19  ;;  %898 = vst [vmem:[#allocation18 + $0x50] sm:$0xff] %v866_v20  ;;  %v837_v27 = vadd.f32 %v2377_v25, %v2185_v16  ;;  %v869_v28 = vadd.f32 %v2385_v26, %v2185_v16  ;;  %v828_v29 = vpop.f32.mrb[3].mxu0  ;;  %v860_v30 = vpop.f32.mrb[3].mxu1 }
 0x21a   : > { %888 = vst [vmem:[#allocation18] sm:$0xff] %v826_v23  ;;  %896 = vst [vmem:[#allocation18 + $0x40] sm:$0xff] %v858_v24  ;;  %v829_v31 = vadd.f32 %v2185_v16, %v828_v29  ;;  %v861_v32 = vadd.f32 %v2185_v16, %v860_v30 }
 0x21b   : > { %891 = vst [vmem:[#allocation18 + $0x18] sm:$0xff] %v837_v27  ;;  %899 = vst [vmem:[#allocation18 + $0x58] sm:$0xff] %v869_v28 }
 0x21c   : > { %889 = vst [vmem:[#allocation18 + $0x8] sm:$0xff] %v829_v31  ;;  %897 = vst [vmem:[#allocation18 + $0x48] sm:$0xff] %v861_v32 }
 0x21e   : > { %v2380_v33 = vpop.f32.mrb[4].mxu0  ;;  %v2388_v34 = vpop.f32.mrb[4].mxu1 }
 0x21f   : > { %v850_v35 = vadd.f32 %v2380_v33, %v2185_v16  ;;  %v882_v36 = vadd.f32 %v2388_v34, %v2185_v16  ;;  %v841_v37 = vpop.f32.mrb[5].mxu0  ;;  %v873_v38 = vpop.f32.mrb[5].mxu1 }
 0x220   : > { %v842_v39 = vadd.f32 %v2185_v16, %v841_v37  ;;  %v874_v40 = vadd.f32 %v2185_v16, %v873_v38  ;;  %v2381_v41 = vpop.f32.mrb[6].mxu0  ;;  %v2389_v42 = vpop.f32.mrb[6].mxu1 }
 0x221   : > { %894 = vst [vmem:[#allocation18 + $0x30] sm:$0xff] %v850_v35  ;;  %902 = vst [vmem:[#allocation18 + $0x70] sm:$0xff] %v882_v36  ;;  %v853_v43 = vadd.f32 %v2381_v41, %v2185_v16  ;;  %v885_v44 = vadd.f32 %v2389_v42, %v2185_v16  ;;  %v844_v45 = vpop.f32.mrb[7].mxu0  ;;  %v876_v46 = vpop.f32.mrb[7].mxu1 }
 0x222   : > { %892 = vst [vmem:[#allocation18 + $0x20] sm:$0xff] %v842_v39  ;;  %900 = vst [vmem:[#allocation18 + $0x60] sm:$0xff] %v874_v40  ;;  %v845_v47 = vadd.f32 %v2185_v16, %v844_v45  ;;  %v877_v48 = vadd.f32 %v2185_v16, %v876_v46 }
 0x223   : > { %895 = vst [vmem:[#allocation18 + $0x38] sm:$0xff] %v853_v43  ;;  %903 = vst [vmem:[#allocation18 + $0x78] sm:$0xff] %v885_v44 }
 0x224   : > { %893 = vst [vmem:[#allocation18 + $0x28] sm:$0xff] %v845_v47  ;;  %901 = vst [vmem:[#allocation18 + $0x68] sm:$0xff] %v877_v48 }
 0x225 PF: > { %v2751_v49 = vld [vmem:[%s3556_s20] sm:$0xff]   ;;  %v2752_v50 = vld [vmem:[%s3556_s20 + $0x8] sm:$0xff]   ;;  %v2753_v51 = vld [vmem:[%s3556_s20 + $0x10] sm:$0xff]   ;;  %p2253_p4 = scmp.eq.s32.totalorder %s3233_s29, 1 }
 0x226   : > { %2390 = vmatprep.subr.bf16.mxu0 %v2751_v49  ;;  %v2754_v52 = vld [vmem:[%s3556_s20 + $0x18] sm:$0xff]   ;;  %v2759_v53 = vld [vmem:[#allocation12] sm:$0xff]   ;;  %v2756_v55 = vld [vmem:[%s3556_s20 + $0x28] sm:$0xff]  }
 0x227   : > { %2391 = vmatpush3.bf16.msra.mxu0 %v2751_v49  ;;  %2406 = vmatprep.mubr.bf16.mxu0 %v2759_v53  ;;  %v2755_v54 = vld [vmem:[%s3556_s20 + $0x20] sm:$0xff]   ;;  %v2757_v56 = vld [vmem:[%s3556_s20 + $0x30] sm:$0xff]   ;;  %v2758_v57 = vld [vmem:[%s3556_s20 + $0x38] sm:$0xff]   ;;  %s1506_s20 = sld [smem:[#allocation2 + %s3233_s29]] }
 0x228   : > { %2392 = vmatprep.subr.bf16.mxu0 %v2752_v50  ;;  %v3599_v58 = vld [vmem:[#allocation18] sm:$0xff]  ;;  %v3601_v59 = vld [vmem:[#allocation18 + $0x8] sm:$0xff]  ;;  %v3605_v62 = vld [vmem:[#allocation18 + $0x10] sm:$0xff] }
 0x229   : > { %v2760_v60 = vld [vmem:[#allocation12 + $0x8] sm:$0xff]   ;;  %v920_v61 = vpack.c.bf16 %v3601_v59, %v3599_v58  ;;  %v3607_v63 = vld [vmem:[#allocation18 + $0x18] sm:$0xff]  ;;  %v2761_v0 = vld [vmem:[#allocation12 + $0x10] sm:$0xff]  }
 0x22a   : > { %v3609_v1 = vld [vmem:[#allocation18 + $0x20] sm:$0xff]  ;;  %v921_v3 = vpack.c.bf16 %v3607_v63, %v3605_v62  ;;  %v3615_v4 = vld [vmem:[#allocation18 + $0x30] sm:$0xff]  ;;  %v3617_v5 = vld [vmem:[#allocation18 + $0x38] sm:$0xff] }
 0x22b   : > { %2393 = vmatpush3.bf16.msra.mxu0 %v2752_v50  ;;  %v3611_v2 = vld [vmem:[#allocation18 + $0x28] sm:$0xff]  ;;  %v2762_v6 = vld [vmem:[#allocation12 + $0x18] sm:$0xff]   ;;  %v2763_v8 = vld [vmem:[#allocation12 + $0x20] sm:$0xff]   ;;  %v923_v11 = vpack.c.bf16 %v3617_v5, %v3615_v4 }
 0x22c   : > { %2394 = vmatprep.subr.bf16.mxu0 %v2753_v51  ;;  %v922_v7 = vpack.c.bf16 %v3611_v2, %v3609_v1  ;;  %v3621_v9 = vld [vmem:[#allocation18 + $0x40] sm:$0xff]  ;;  %v3623_v10 = vld [vmem:[#allocation18 + $0x48] sm:$0xff]  ;;  %v3627_v12 = vld [vmem:[#allocation18 + $0x50] sm:$0xff] }
 0x22d   : > { %v924_v13 = vpack.c.bf16 %v3623_v10, %v3621_v9  ;;  %v3631_v14 = vld [vmem:[#allocation18 + $0x58] sm:$0xff]  ;;  %v2764_v15 = vld [vmem:[#allocation12 + $0x28] sm:$0xff]   ;;  %v2765_v16 = vld [vmem:[#allocation12 + $0x30] sm:$0xff]  }
 0x22e   : > { %v925_v17 = vpack.c.bf16 %v3631_v14, %v3627_v12  ;;  %v3635_v18 = vld [vmem:[#allocation18 + $0x60] sm:$0xff]  ;;  %v3637_v19 = vld [vmem:[#allocation18 + $0x68] sm:$0xff]  ;;  %v3641_v21 = vld [vmem:[#allocation18 + $0x70] sm:$0xff] }
 0x22f   : > { %2395 = vmatpush3.bf16.msra.mxu0 %v2753_v51  ;;  %v926_v20 = vpack.c.bf16 %v3637_v19, %v3635_v18  ;;  %v3643_v22 = vld [vmem:[#allocation18 + $0x78] sm:$0xff]  ;;  %v2767_v24 = vld [vmem:[#allocation9] sm:$0xff]   ;;  %v2768_v26 = vld [vmem:[#allocation9 + $0x8] sm:$0xff]  }
 0x230   : > { %2396 = vmatprep.subr.bf16.mxu0 %v2754_v52  ;;  %v2766_v23 = vld [vmem:[#allocation12 + $0x38] sm:$0xff]   ;;  %v927_v25 = vpack.c.bf16 %v3643_v22, %v3641_v21  ;;  %v2769_v27 = vld [vmem:[#allocation9 + $0x10] sm:$0xff]   ;;  %v2771_v29 = vld [vmem:[#allocation9 + $0x20] sm:$0xff]  }
 0x231   : > { %v2770_v28 = vld [vmem:[#allocation9 + $0x18] sm:$0xff]   ;;  %v2772_v30 = vld [vmem:[#allocation9 + $0x28] sm:$0xff]   ;;  %v2773_v31 = vld [vmem:[#allocation9 + $0x30] sm:$0xff]  }
 0x232   : > { %v2774_v32 = vld [vmem:[#allocation9 + $0x38] sm:$0xff]   ;;  %v2775_v33 = vld [vmem:[#allocation10] sm:$0xff]   ;;  %v2202_v34 = vld [vmem:[%s644_s2] ss:$0 sm:$0xff] }
 0x233   : > { %2397 = vmatpush3.bf16.msra.mxu0 %v2754_v52  ;;  %2470 = vmatprep.mubr.bf16.mxu1 %v2775_v33 }
 0x234   : > { %2398 = vmatprep.subr.bf16.mxu0 %v2755_v54 }
 0x237   : > { %2399 = vmatpush3.bf16.msra.mxu0 %v2755_v54 }
 0x238   : > { %2400 = vmatprep.subr.bf16.mxu0 %v2756_v55 }
 0x23b   : > { %2401 = vmatpush3.bf16.msra.mxu0 %v2756_v55 }
 0x23c   : > { %2402 = vmatprep.subr.bf16.mxu0 %v2757_v56 }
 0x23f   : > { %2403 = vmatpush3.bf16.msra.mxu0 %v2757_v56 }
 0x240   : > { %2404 = vmatprep.subr.bf16.mxu0 %v2758_v57 }
 0x243   : > { %2405 = vmatpush3.bf16.msra.mxu0 %v2758_v57 }
 0x244   : > { %2422 = vmatprep.subr.bf16.mxu0 %v920_v61 }
 0x246   : > { %2407 = vmatmul.mubr.bf16.vlgmr.msra.gmra.mrb[0].mxu0 %v2760_v60 }
 0x247   : > { %2423 = vmatpush3.bf16.msra.mxu0 %v920_v61  ;;  %2410 = vmatprep.mubr.bf16.mxu0 %v2761_v0 }
 0x248   : > { %2424 = vmatprep.subr.bf16.mxu0 %v921_v3 }
 0x24b   : > { %2425 = vmatpush3.bf16.msra.mxu0 %v921_v3 }
 0x24c   : > { %2426 = vmatprep.subr.bf16.mxu0 %v922_v7 }
 0x24e   : > { %2411 = vmatmul.mubr.bf16.gmra.mrb[4].mxu0 %v2762_v6 }
 0x24f   : > { %2427 = vmatpush3.bf16.msra.mxu0 %v922_v7  ;;  %2414 = vmatprep.mubr.bf16.mxu0 %v2763_v8 }
 0x250   : > { %2428 = vmatprep.subr.bf16.mxu0 %v923_v11 }
 0x253   : > { %2429 = vmatpush3.bf16.msra.mxu0 %v923_v11 }
 0x254   : > { %2430 = vmatprep.subr.bf16.mxu0 %v924_v13 }
 0x256   : > { %2415 = vmatmul.mubr.bf16.gmra.mrb[8].mxu0 %v2764_v15 }
 0x257   : > { %2431 = vmatpush3.bf16.msra.mxu0 %v924_v13  ;;  %2418 = vmatprep.mubr.bf16.mxu0 %v2765_v16 }
 0x258   : > { %2432 = vmatprep.subr.bf16.mxu0 %v925_v17 }
 0x25b   : > { %2433 = vmatpush3.bf16.msra.mxu0 %v925_v17 }
 0x25c   : > { %2434 = vmatprep.subr.bf16.mxu0 %v926_v20 }
 0x25e   : > { %2419 = vmatmul.mubr.bf16.gmra.mrb[12].mxu0 %v2766_v23 }
 0x25f   : > { %2435 = vmatpush3.bf16.msra.mxu0 %v926_v20  ;;  %2438 = vmatprep.mubr.bf16.mxu0 %v2767_v24 }
 0x260   : > { %2436 = vmatprep.subr.bf16.mxu0 %v927_v25 }
 0x263   : > { %2437 = vmatpush3.bf16.msra.mxu0 %v927_v25 }
 0x266   : > { %2439 = vmatmul.mubr.bf16.vlgmr.msra.gmra.mrb[0].mxu0 %v2768_v26 }
 0x267   : > { %2442 = vmatprep.mubr.bf16.mxu0 %v2769_v27 }
 0x26e   : > { %2443 = vmatmul.mubr.bf16.gmra.mrb[4].mxu0 %v2770_v28 }
 0x26f   : > { %2446 = vmatprep.mubr.bf16.mxu0 %v2771_v29 }
 0x276   : > { %2447 = vmatmul.mubr.bf16.gmra.mrb[8].mxu0 %v2772_v30 }
 0x277   : > { %2450 = vmatprep.mubr.bf16.mxu0 %v2773_v31 }
 0x27e   : > { %2451 = vmatmul.mubr.bf16.gmra.mrb[12].mxu0 %v2774_v32 }
 0x339   : > { %v2440_v35 = vpop.f32.mrb[0].mxu0 }
 0x33a   : > { %v2582_v36 = vadd.f32 %v2440_v35, %v2202_v34  ;;  %v1258_v37 = vpop.f32.mrb[1].mxu0 }
 0x33b   : > { %v2583_v38 = vadd.f32 %v2202_v34, %v1258_v37  ;;  %v2441_v39 = vpop.f32.mrb[2].mxu0 }
 0x33c   : > { %v2584_v40 = vadd.f32 %v2441_v39, %v2202_v34  ;;  %v1261_v41 = vpop.f32.mrb[3].mxu0  ;;  %v1323_v43 = vmax.f32 %v2582_v36, 0.0 }
 0x33d   : > { %v2585_v42 = vadd.f32 %v2202_v34, %v1261_v41  ;;  %v1321_v45 = vmax.f32 %v2583_v38, 0.0 }
 0x33e   : > { %v1324_v44 = vmax.f32 %v2584_v40, 0.0 }
 0x33f   : > { %v1322_v46 = vmax.f32 %v2585_v42, 0.0 }
 0x340   : > { %v1354_v47 = vpack.c.bf16 %v1324_v44, %v1323_v43  ;;  %v2783_v44 = vld [vmem:[%s3562_s24] sm:$0xff]  }
 0x341   : > { %v2444_v48 = vpop.f32.mrb[4].mxu0  ;;  %v1353_v49 = vpack.c.bf16 %v1322_v46, %v1321_v45  ;;  %v2776_v45 = vld [vmem:[#allocation10 + $0x8] sm:$0xff]   ;;  %v2777_v46 = vld [vmem:[#allocation10 + $0x10] sm:$0xff]  }
 0x342   : > { %v2586_v50 = vadd.f32 %v2444_v48, %v2202_v34  ;;  %v1274_v51 = vpop.f32.mrb[5].mxu0  ;;  %v2778_v48 = vld [vmem:[#allocation10 + $0x18] sm:$0xff]  }
 0x343   : > { %v2587_v52 = vadd.f32 %v2202_v34, %v1274_v51  ;;  %v2445_v53 = vpop.f32.mrb[6].mxu0  ;;  %2454 = vmatprep.subr.bf16.mxu1 %v1353_v49  ;;  %v2787_v51 = vld [vmem:[%s3562_s24 + $0x20] sm:$0xff]  }
 0x344   : > { %v2588_v54 = vadd.f32 %v2445_v53, %v2202_v34  ;;  %v1277_v55 = vpop.f32.mrb[7].mxu0  ;;  %2455 = vmatpush3.bf16.msra.mxu1 %v1353_v49  ;;  %v1327_v57 = vmax.f32 %v2586_v50, 0.0  ;;  %v2779_v49 = vld [vmem:[#allocation10 + $0x20] sm:$0xff]   ;;  %v2786_v50 = vld [vmem:[%s3562_s24 + $0x18] sm:$0xff]   ;;  %v2781_v53 = vld [vmem:[#allocation10 + $0x30] sm:$0xff]  }
 0x345   : > { %v2589_v56 = vadd.f32 %v2202_v34, %v1277_v55  ;;  %2456 = vmatprep.subr.bf16.mxu1 %v1354_v47  ;;  %v1325_v61 = vmax.f32 %v2587_v52, 0.0  ;;  %v2780_v52 = vld [vmem:[#allocation10 + $0x28] sm:$0xff]   ;;  %v2782_v55 = vld [vmem:[#allocation10 + $0x38] sm:$0xff]  }
 0x346   : > { %v1328_v60 = vmax.f32 %v2588_v54, 0.0  ;;  %v2788_v54 = vld [vmem:[%s3562_s24 + $0x28] sm:$0xff]  }
 0x347   : > { %v1326_v0 = vmax.f32 %v2589_v56, 0.0  ;;  %v2789_v56 = vld [vmem:[%s3562_s24 + $0x30] sm:$0xff]  }
 0x348   : > { %v1356_v3 = vpack.c.bf16 %v1328_v60, %v1327_v57  ;;  %2457 = vmatpush3.bf16.msra.mxu1 %v1354_v47  ;;  %v2785_v47 = vld [vmem:[%s3562_s24 + $0x10] sm:$0xff]   ;;  %v2790_v57 = vld [vmem:[%s3562_s24 + $0x38] sm:$0xff]   ;;  %v2791_v60 = vld [vmem:[%s3564_s18] sm:$0xff]  }
 0x349   : > { %v1355_v6 = vpack.c.bf16 %v1326_v0, %v1325_v61  ;;  %v2448_v7 = vpop.f32.mrb[8].mxu0  ;;  %v2792_v61 = vld [vmem:[%s3564_s18 + $0x8] sm:$0xff]   ;;  %2518 = vmatprep.subr.bf16.mxu0 %v2791_v60  ;;  %v2793_v0 = vld [vmem:[%s3564_s18 + $0x10] sm:$0xff]  }
 0x34a   : > { %v2590_v8 = vadd.f32 %v2448_v7, %v2202_v34  ;;  %v1290_v11 = vpop.f32.mrb[9].mxu0  ;;  %2519 = vmatpush3.bf16.msra.mxu0 %v2791_v60  ;;  %v3673_v7 = vld [vmem:[%s3564_s18 + $0x28] sm:$0xff]  }
 0x34b   : > { %v2591_v13 = vadd.f32 %v2202_v34, %v1290_v11  ;;  %v2449_v15 = vpop.f32.mrb[10].mxu0  ;;  %2458 = vmatprep.subr.bf16.mxu1 %v1355_v6  ;;  %2520 = vmatprep.subr.bf16.mxu0 %v2792_v61 }
 0x34c   : > { %v2592_v16 = vadd.f32 %v2449_v15, %v2202_v34  ;;  %v1293_v17 = vpop.f32.mrb[11].mxu0  ;;  %2459 = vmatpush3.bf16.msra.mxu1 %v1355_v6  ;;  %v1331_v23 = vmax.f32 %v2590_v8, 0.0  ;;  %v3668_v6 = vld [vmem:[%s3564_s18 + $0x20] sm:$0xff]  }
 0x34d   : > { %v2593_v20 = vadd.f32 %v2202_v34, %v1293_v17  ;;  %2460 = vmatprep.subr.bf16.mxu1 %v1356_v3  ;;  %v1329_v25 = vmax.f32 %v2591_v13, 0.0 }
 0x34e   : > { %v1332_v24 = vmax.f32 %v2592_v16, 0.0  ;;  %2521 = vmatpush3.bf16.msra.mxu0 %v2792_v61 }
 0x34f   : > { %v1330_v26 = vmax.f32 %v2593_v20, 0.0  ;;  %2522 = vmatprep.subr.bf16.mxu0 %v2793_v0 }
 0x350   : > { %v1358_v27 = vpack.c.bf16 %v1332_v24, %v1331_v23  ;;  %2461 = vmatpush3.bf16.msra.mxu1 %v1356_v3  ;;  %v3664_v3 = vld [vmem:[%s3564_s18 + $0x18] sm:$0xff]  }
 0x351   : > { %v1357_v28 = vpack.c.bf16 %v1330_v26, %v1329_v25  ;;  %v2452_v29 = vpop.f32.mrb[12].mxu0 }
 0x352   : > { %v2594_v30 = vadd.f32 %v2452_v29, %v2202_v34  ;;  %v1306_v31 = vpop.f32.mrb[13].mxu0  ;;  %2523 = vmatpush3.bf16.msra.mxu0 %v2793_v0 }
 0x353   : > { %v2595_v32 = vadd.f32 %v2202_v34, %v1306_v31  ;;  %v2453_v33 = vpop.f32.mrb[14].mxu0  ;;  %2462 = vmatprep.subr.bf16.mxu1 %v1357_v28  ;;  %2524 = vmatprep.subr.bf16.mxu0 %v3664_v3 }
 0x354   : > { %v2596_v35 = vadd.f32 %v2453_v33, %v2202_v34  ;;  %v1309_v36 = vpop.f32.mrb[15].mxu0  ;;  %2463 = vmatpush3.bf16.msra.mxu1 %v1357_v28  ;;  %v1335_v38 = vmax.f32 %v2594_v30, 0.0 }
 0x355   : > { %v2597_v37 = vadd.f32 %v2202_v34, %v1309_v36  ;;  %2464 = vmatprep.subr.bf16.mxu1 %v1358_v27  ;;  %v1333_v40 = vmax.f32 %v2595_v32, 0.0  ;;  %v2784_v34 = vld [vmem:[%s3562_s24 + $0x8] sm:$0xff]   ;;  %s1507_s24 = sadd.f32 1.0, %s1506_s20 }
 0x356   : > { %v1336_v39 = vmax.f32 %v2596_v35, 0.0  ;;  %2525 = vmatpush3.bf16.msra.mxu0 %v3664_v3 }
 0x357   : > { %v1334_v41 = vmax.f32 %v2597_v37, 0.0  ;;  %2526 = vmatprep.subr.bf16.mxu0 %v3668_v6  ;;  %v1508_v8 = vstv %s1507_s24 }
 0x358   : > { %v1360_v42 = vpack.c.bf16 %v1336_v39, %v1335_v38  ;;  %2465 = vmatpush3.bf16.msra.mxu1 %v1358_v27  ;;  %v1511_v11 = vmul.f32 %v1508_v8, %v3605_v62  ;;  %v1512_v13 = vmul.f32 %v1508_v8, %v3607_v63  ;;  %v1509_v16 = vmul.f32 %v1508_v8, %v3599_v58 }
 0x359   : > { %v1359_v43 = vpack.c.bf16 %v1334_v41, %v1333_v40  ;;  %v1510_v17 = vmul.f32 %v1508_v8, %v3601_v59  ;;  %v1515_v31 = vmul.f32 %v1508_v8, %v3615_v4  ;;  %v1516_v62 = vmul.f32 %v1508_v8, %v3617_v5 }
 0x35a   : > { %2527 = vmatpush3.bf16.msra.mxu0 %v3668_v6  ;;  %v1513_v63 = vmul.f32 %v1508_v8, %v3609_v1  ;;  %v1514_v58 = vmul.f32 %v1508_v8, %v3611_v2  ;;  %v1519_v5 = vmul.f32 %v1508_v8, %v3627_v12  ;;  %v1520_v41 = vmul.f32 %v1508_v8, %v3631_v14 }
 0x35b   : > { %2466 = vmatprep.subr.bf16.mxu1 %v1359_v43  ;;  %2528 = vmatprep.subr.bf16.mxu0 %v3673_v7  ;;  %v1517_v2 = vmul.f32 %v1508_v8, %v3621_v9  ;;  %v1524_v9 = vmul.f32 %v1508_v8, %v3643_v22 }
 0x35c   : > { %2467 = vmatpush3.bf16.msra.mxu1 %v1359_v43 }
 0x35d   : > { %2468 = vmatprep.subr.bf16.mxu1 %v1360_v42 }
 0x35e   : > { %2529 = vmatpush3.bf16.msra.mxu0 %v3673_v7 }
 0x360   : > { %2469 = vmatpush3.bf16.msra.mxu1 %v1360_v42  ;;  %v1518_v42 = vmul.f32 %v1508_v8, %v3623_v10 }
 0x361   : > { %2486 = vmatprep.subr.bf16.mxu1 %v2783_v44 }
 0x363   : > { %2471 = vmatmul.mubr.bf16.vlgmr.msra.gmra.mrb[0].mxu1 %v2776_v45 }
 0x364   : > { %2474 = vmatprep.mubr.bf16.mxu1 %v2777_v46  ;;  %2487 = vmatpush3.bf16.msra.mxu1 %v2783_v44 }
 0x365   : > { %2488 = vmatprep.subr.bf16.mxu1 %v2784_v34 }
 0x368   : > { %2489 = vmatpush3.bf16.msra.mxu1 %v2784_v34 }
 0x369   : > { %2490 = vmatprep.subr.bf16.mxu1 %v2785_v47 }
 0x36b   : > { %2475 = vmatmul.mubr.bf16.gmra.mrb[4].mxu1 %v2778_v48 }
 0x36c   : > { %2478 = vmatprep.mubr.bf16.mxu1 %v2779_v49  ;;  %2491 = vmatpush3.bf16.msra.mxu1 %v2785_v47  ;;  %v1523_v49 = vmul.f32 %v1508_v8, %v3641_v21 }
 0x36d   : > { %2492 = vmatprep.subr.bf16.mxu1 %v2786_v50 }
 0x370   : > { %2493 = vmatpush3.bf16.msra.mxu1 %v2786_v50  ;;  %v1521_v50 = vmul.f32 %v1508_v8, %v3635_v18  ;;  %v2797_v18 = vld [vmem:[%s3564_s18 + $0x30] sm:$0xff]  }
 0x371   : > { %2494 = vmatprep.subr.bf16.mxu1 %v2787_v51  ;;  %2530 = vmatprep.subr.bf16.mxu0 %v2797_v18 }
 0x372   : > { %2531 = vmatpush3.bf16.msra.mxu0 %v2797_v18 }
 0x373   : > { %2479 = vmatmul.mubr.bf16.gmra.mrb[8].mxu1 %v2780_v52 }
 0x374   : > { %2482 = vmatprep.mubr.bf16.mxu1 %v2781_v53  ;;  %2495 = vmatpush3.bf16.msra.mxu1 %v2787_v51  ;;  %v1522_v51 = vmul.f32 %v1508_v8, %v3637_v19  ;;  %v2798_v19 = vld [vmem:[%s3564_s18 + $0x38] sm:$0xff]  }
 0x375   : > { %2496 = vmatprep.subr.bf16.mxu1 %v2788_v54  ;;  %2532 = vmatprep.subr.bf16.mxu0 %v2798_v19 }
 0x376   : > { %2533 = vmatpush3.bf16.msra.mxu0 %v2798_v19 }
 0x378   : > { %2497 = vmatpush3.bf16.msra.mxu1 %v2788_v54 }
 0x379   : > { %2498 = vmatprep.subr.bf16.mxu1 %v2789_v56 }
 0x37b   : > { %2483 = vmatmul.mubr.bf16.gmra.mrb[12].mxu1 %v2782_v55 }
 0x37c   : > { %2499 = vmatpush3.bf16.msra.mxu1 %v2789_v56 }
 0x37d   : > { %2500 = vmatprep.subr.bf16.mxu1 %v2790_v57 }
 0x380   : > { %2501 = vmatpush3.bf16.msra.mxu1 %v2790_v57 }
 0x381   : > { %2566 = vmatprep.subr.bf16.mxu1 %v2791_v60 }
 0x436   : > { %v2472_v15 = vpop.f32.mrb[0].mxu1 }
 0x437   : > { %v1443_v20 = vpop.f32.mrb[1].mxu1  ;;  %v1527_v24 = vadd.f32 %v2472_v15, %v1511_v11 }
 0x438   : > { %v2473_v23 = vpop.f32.mrb[2].mxu1  ;;  %v1525_v27 = vadd.f32 %v1509_v16, %v1443_v20 }
 0x439   : > { %v1528_v25 = vadd.f32 %v2473_v23, %v1512_v13  ;;  %v1446_v26 = vpop.f32.mrb[3].mxu1 }
 0x43a   : > { %v1526_v28 = vadd.f32 %v1510_v17, %v1446_v26 }
 0x43b   : > { %v1542_v29 = vpack.c.bf16 %v1528_v25, %v1527_v24 }
 0x43c   : > { %v1541_v30 = vpack.c.bf16 %v1526_v28, %v1525_v27 }
 0x43e   : > { %v2476_v32 = vpop.f32.mrb[4].mxu1  ;;  %2502 = vmatprep.mubr.bf16.mxu1 %v1541_v30 }
 0x43f   : > { %v1459_v59 = vpop.f32.mrb[5].mxu1  ;;  %2503 = vmatmul.mubr.bf16.vlgmr.msra.gmra.mrb[16].mxu1 %v1542_v29  ;;  %v1531_v35 = vadd.f32 %v2476_v32, %v1515_v31 }
 0x440   : > { %v2477_v33 = vpop.f32.mrb[6].mxu1  ;;  %2574 = vmatpush3.bf16.msra.mxu1 %v2791_v60  ;;  %v1529_v38 = vadd.f32 %v1513_v63, %v1459_v59 }
 0x441   : > { %v1532_v36 = vadd.f32 %v2477_v33, %v1516_v62  ;;  %v1462_v37 = vpop.f32.mrb[7].mxu1  ;;  %2567 = vmatprep.subr.bf16.mxu1 %v2792_v61 }
 0x442   : > { %v1530_v39 = vadd.f32 %v1514_v58, %v1462_v37 }
 0x443   : > { %v1544_v40 = vpack.c.bf16 %v1532_v36, %v1531_v35 }
 0x444   : > { %v1543_v4 = vpack.c.bf16 %v1530_v39, %v1529_v38  ;;  %2575 = vmatpush3.bf16.msra.mxu1 %v2792_v61  ;;  %v2235_v61 = vld [vmem:[%s647_s10] ss:$0 sm:$0xff] }
 0x445   : > { %2568 = vmatprep.subr.bf16.mxu1 %v2793_v0 }
 0x446   : > { %v2480_v1 = vpop.f32.mrb[8].mxu1  ;;  %2506 = vmatprep.mubr.bf16.mxu1 %v1543_v4 }
 0x447   : > { %v1475_v43 = vpop.f32.mrb[9].mxu1  ;;  %2507 = vmatmul.mubr.bf16.gmra.mrb[20].mxu1 %v1544_v40  ;;  %v1535_v45 = vadd.f32 %v2480_v1, %v1519_v5 }
 0x448   : > { %v2481_v44 = vpop.f32.mrb[10].mxu1  ;;  %2576 = vmatpush3.bf16.msra.mxu1 %v2793_v0  ;;  %v1533_v47 = vadd.f32 %v1517_v2, %v1475_v43 }
 0x449   : > { %v1536_v46 = vadd.f32 %v2481_v44, %v1520_v41  ;;  %v1478_v34 = vpop.f32.mrb[11].mxu1  ;;  %2569 = vmatprep.subr.bf16.mxu1 %v3664_v3 }
 0x44a   : > { %v1534_v12 = vadd.f32 %v1518_v42, %v1478_v34 }
 0x44b   : > { %v1546_v48 = vpack.c.bf16 %v1536_v46, %v1535_v45 }
 0x44c   : > { %v1545_v14 = vpack.c.bf16 %v1534_v12, %v1533_v47  ;;  %2577 = vmatpush3.bf16.msra.mxu1 %v3664_v3 }
 0x44d   : > { %2570 = vmatprep.subr.bf16.mxu1 %v3668_v6 }
 0x44e   : > { %v2484_v10 = vpop.f32.mrb[12].mxu1  ;;  %2510 = vmatprep.mubr.bf16.mxu1 %v1545_v14 }
 0x44f   : > { %v1491_v52 = vpop.f32.mrb[13].mxu1  ;;  %2511 = vmatmul.mubr.bf16.gmra.mrb[24].mxu1 %v1546_v48  ;;  %v1539_v54 = vadd.f32 %v2484_v10, %v1523_v49 }
 0x450   : > { %v2485_v53 = vpop.f32.mrb[14].mxu1  ;;  %2578 = vmatpush3.bf16.msra.mxu1 %v3668_v6  ;;  %v1537_v22 = vadd.f32 %v1521_v50, %v1491_v52 }
 0x451   : > { %v1540_v55 = vadd.f32 %v2485_v53, %v1524_v9  ;;  %v1494_v21 = vpop.f32.mrb[15].mxu1  ;;  %2571 = vmatprep.subr.bf16.mxu1 %v3673_v7 }
 0x452   : > { %v1538_v56 = vadd.f32 %v1522_v51, %v1494_v21  ;;  %v2244_v21 = vld [vmem:[%s650_s8] ss:$0 sm:$0xff] }
 0x453   : > { %v1548_v57 = vpack.c.bf16 %v1540_v55, %v1539_v54 }
 0x454   : > { %v1547_v60 = vpack.c.bf16 %v1538_v56, %v1537_v22  ;;  %2579 = vmatpush3.bf16.msra.mxu1 %v3673_v7 }
 0x455   : > { %2572 = vmatprep.subr.bf16.mxu1 %v2797_v18 }
 0x456   : > { %2514 = vmatprep.mubr.bf16.mxu1 %v1547_v60 }
 0x457   : > { %2515 = vmatmul.mubr.bf16.gmra.mrb[28].mxu1 %v1548_v57 }
 0x458   : > { %2580 = vmatpush3.bf16.msra.mxu1 %v2797_v18 }
 0x459   : > { %2573 = vmatprep.subr.bf16.mxu1 %v2798_v19 }
 0x45c   : > { %2581 = vmatpush3.bf16.msra.mxu1 %v2798_v19 }
 0x512   : > { %v2504_v0 = vpop.f32.mrb[16].mxu1 }
 0x513   : > { %v1663_v3 = vadd.f32 %v2504_v0, %v2235_v61  ;;  %v1654_v6 = vpop.f32.mrb[17].mxu1 }
 0x514   : > { %v1655_v7 = vadd.f32 %v2235_v61, %v1654_v6  ;;  %v2505_v8 = vpop.f32.mrb[18].mxu1 }
 0x515   : > { %v1666_v11 = vadd.f32 %v2505_v8, %v2235_v61  ;;  %v1657_v13 = vpop.f32.mrb[19].mxu1  ;;  %v1719_v16 = vmax.f32 %v1663_v3, 0.0 }
 0x516   : > { %v1658_v15 = vadd.f32 %v2235_v61, %v1657_v13  ;;  %v1717_v20 = vmax.f32 %v1655_v7, 0.0 }
 0x517   : > { %v1720_v17 = vmax.f32 %v1666_v11, 0.0 }
 0x518   : > { %v1718_v23 = vmax.f32 %v1658_v15, 0.0 }
 0x519   : > { %v1734_v24 = vpack.c.bf16 %v1720_v17, %v1719_v16 }
 0x51a   : > { %v1733_v25 = vpack.c.bf16 %v1718_v23, %v1717_v20  ;;  %v2508_v26 = vpop.f32.mrb[20].mxu1 }
 0x51b   : > { %v1679_v27 = vadd.f32 %v2508_v26, %v2235_v61  ;;  %v1670_v28 = vpop.f32.mrb[21].mxu1 }
 0x51c   : > { %v1671_v29 = vadd.f32 %v2235_v61, %v1670_v28  ;;  %v2509_v30 = vpop.f32.mrb[22].mxu1  ;;  %2534 = vmatprep.mubr.bf16.mxu0 %v1733_v25 }
 0x51d   : > { %v1682_v31 = vadd.f32 %v2509_v30, %v2235_v61  ;;  %v1673_v62 = vpop.f32.mrb[23].mxu1  ;;  %2535 = vmatmul.mubr.bf16.vlgmr.msra.gmra.mrb[16].mxu0 %v1734_v24  ;;  %v1723_v63 = vmax.f32 %v1679_v27, 0.0 }
 0x51e   : > { %v1674_v32 = vadd.f32 %v2235_v61, %v1673_v62  ;;  %v1721_v59 = vmax.f32 %v1671_v29, 0.0 }
 0x51f   : > { %v1724_v58 = vmax.f32 %v1682_v31, 0.0 }
 0x520   : > { %v1722_v33 = vmax.f32 %v1674_v32, 0.0 }
 0x521   : > { %v1736_v35 = vpack.c.bf16 %v1724_v58, %v1723_v63 }
 0x522   : > { %v1735_v36 = vpack.c.bf16 %v1722_v33, %v1721_v59  ;;  %v2512_v37 = vpop.f32.mrb[24].mxu1 }
 0x523   : > { %v1695_v38 = vadd.f32 %v2512_v37, %v2235_v61  ;;  %v1686_v39 = vpop.f32.mrb[25].mxu1 }
 0x524   : > { %v1687_v40 = vadd.f32 %v2235_v61, %v1686_v39  ;;  %v2513_v4 = vpop.f32.mrb[26].mxu1  ;;  %2538 = vmatprep.mubr.bf16.mxu0 %v1735_v36 }
 0x525   : > { %v1698_v5 = vadd.f32 %v2513_v4, %v2235_v61  ;;  %v1689_v41 = vpop.f32.mrb[27].mxu1  ;;  %2539 = vmatmul.mubr.bf16.gmra.mrb[20].mxu0 %v1736_v35  ;;  %v1727_v2 = vmax.f32 %v1695_v38, 0.0 }
 0x526   : > { %v1690_v1 = vadd.f32 %v2235_v61, %v1689_v41  ;;  %v1725_v43 = vmax.f32 %v1687_v40, 0.0 }
 0x527   : > { %v1728_v42 = vmax.f32 %v1698_v5, 0.0 }
 0x528   : > { %v1726_v44 = vmax.f32 %v1690_v1, 0.0 }
 0x529   : > { %v1738_v45 = vpack.c.bf16 %v1728_v42, %v1727_v2 }
 0x52a   : > { %v1737_v46 = vpack.c.bf16 %v1726_v44, %v1725_v43  ;;  %v2516_v34 = vpop.f32.mrb[28].mxu1 }
 0x52b   : > { %v1711_v47 = vadd.f32 %v2516_v34, %v2235_v61  ;;  %v1702_v12 = vpop.f32.mrb[29].mxu1 }
 0x52c   : > { %v1703_v48 = vadd.f32 %v2235_v61, %v1702_v12  ;;  %v2517_v14 = vpop.f32.mrb[30].mxu1  ;;  %2542 = vmatprep.mubr.bf16.mxu1 %v1737_v46 }
 0x52d   : > { %v1714_v49 = vadd.f32 %v2517_v14, %v2235_v61  ;;  %v1705_v9 = vpop.f32.mrb[31].mxu1  ;;  %2543 = vmatmul.mubr.bf16.vlgmr.msra.gmra.mrb[32].mxu1 %v1738_v45  ;;  %v1731_v50 = vmax.f32 %v1711_v47, 0.0 }
 0x52e   : > { %v1706_v10 = vadd.f32 %v2235_v61, %v1705_v9  ;;  %v1729_v52 = vmax.f32 %v1703_v48, 0.0 }
 0x52f   : > { %v1732_v51 = vmax.f32 %v1714_v49, 0.0 }
 0x530   : > { %v1730_v53 = vmax.f32 %v1706_v10, 0.0 }
 0x531   : > { %v1740_v54 = vpack.c.bf16 %v1732_v51, %v1731_v50 }
 0x532   : > { %v1739_v55 = vpack.c.bf16 %v1730_v53, %v1729_v52 }
 0x534   : > { %2546 = vmatprep.mubr.bf16.mxu1 %v1739_v55 }
 0x535   : > { %2547 = vmatmul.mubr.bf16.gmra.mrb[36].mxu1 %v1740_v54 }
 0x5f0   : > { %v2536_v22 = vpop.f32.mrb[16].mxu0 }
 0x5f1   : > { %v3713_v56 = vadd.f32 %v2536_v22, %v2244_v21  ;;  %v1846_v57 = vpop.f32.mrb[17].mxu0 }
 0x5f2   : > { %v3715_v60 = vadd.f32 %v2244_v21, %v1846_v57  ;;  %v2537_v18 = vpop.f32.mrb[18].mxu0 }
 0x5f3   : > { %v3717_v19 = vadd.f32 %v2537_v18, %v2244_v21  ;;  %v1849_v61 = vpop.f32.mrb[19].mxu0  ;;  %v1916_v36 = vmax.f32 (!%p2253_p4), %v3713_v56, 0.0 }
 0x5f4   : > { %v1850_v0 = vadd.f32 %v2244_v21, %v1849_v61  ;;  %v1914_v33 = vmax.f32 (!%p2253_p4), %v3715_v60, 0.0 }
 0x5f5   : > { %v1917_v37 = vmax.f32 (!%p2253_p4), %v3717_v19, 0.0  ;;  %1932 = vst [vmem:[#allocation18 + $0x10] sm:$0xff] (!%p2253_p4), %v1916_v36 }
 0x5f6   : > { %v1915_v35 = vmax.f32 (!%p2253_p4), %v1850_v0, 0.0  ;;  %1930 = vst [vmem:[#allocation18] sm:$0xff] (!%p2253_p4), %v1914_v33 }
 0x5f7   : > { %1933 = vst [vmem:[#allocation18 + $0x18] sm:$0xff] (!%p2253_p4), %v1917_v37 }
 0x5f8   : > { %v2540_v3 = vpop.f32.mrb[20].mxu0  ;;  %1931 = vst [vmem:[#allocation18 + $0x8] sm:$0xff] (!%p2253_p4), %v1915_v35 }
 0x5f9   : > { %v3719_v6 = vadd.f32 %v2540_v3, %v2244_v21  ;;  %v1862_v7 = vpop.f32.mrb[21].mxu0 }
 0x5fa   : > { %v1863_v8 = vadd.f32 %v2244_v21, %v1862_v7  ;;  %v2541_v11 = vpop.f32.mrb[22].mxu0 }
 0x5fb   : > { %v1874_v13 = vadd.f32 %v2541_v11, %v2244_v21  ;;  %v1865_v15 = vpop.f32.mrb[23].mxu0  ;;  %v1920_v40 = vmax.f32 (!%p2253_p4), %v3719_v6, 0.0 }
 0x5fc   : > { %v1866_v16 = vadd.f32 %v2244_v21, %v1865_v15  ;;  %v1918_v38 = vmax.f32 (!%p2253_p4), %v1863_v8, 0.0 }
 0x5fd   : > { %v1921_v4 = vmax.f32 (!%p2253_p4), %v1874_v13, 0.0  ;;  %1936 = vst [vmem:[#allocation18 + $0x30] sm:$0xff] (!%p2253_p4), %v1920_v40 }
 0x5fe   : > { %v1919_v39 = vmax.f32 (!%p2253_p4), %v1866_v16, 0.0  ;;  %1934 = vst [vmem:[#allocation18 + $0x20] sm:$0xff] (!%p2253_p4), %v1918_v38 }
 0x5ff   : > { %1937 = vst [vmem:[#allocation18 + $0x38] sm:$0xff] (!%p2253_p4), %v1921_v4 }
 0x600   : > { %v2544_v17 = vpop.f32.mrb[32].mxu1  ;;  %1935 = vst [vmem:[#allocation18 + $0x28] sm:$0xff] (!%p2253_p4), %v1919_v39 }
 0x601   : > { %v1887_v20 = vadd.f32 %v2544_v17, %v2244_v21  ;;  %v1878_v23 = vpop.f32.mrb[33].mxu1 }
 0x602   : > { %v1879_v24 = vadd.f32 %v2244_v21, %v1878_v23  ;;  %v2545_v25 = vpop.f32.mrb[34].mxu1 }
 0x603   : > { %v1890_v26 = vadd.f32 %v2545_v25, %v2244_v21  ;;  %v1881_v27 = vpop.f32.mrb[35].mxu1  ;;  %v1924_v1 = vmax.f32 (!%p2253_p4), %v1887_v20, 0.0 }
 0x604   : > { %v1882_v28 = vadd.f32 %v2244_v21, %v1881_v27  ;;  %v1922_v5 = vmax.f32 (!%p2253_p4), %v1879_v24, 0.0 }
 0x605   : > { %v1925_v2 = vmax.f32 (!%p2253_p4), %v1890_v26, 0.0  ;;  %1940 = vst [vmem:[#allocation18 + $0x50] sm:$0xff] (!%p2253_p4), %v1924_v1 }
 0x606   : > { %1913 = sbr.rel (%p2253_p4) target bundleno = 1553 (0x611), region = 116  ;;  %v1923_v41 = vmax.f32 (!%p2253_p4), %v1882_v28, 0.0  ;;  %1938 = vst [vmem:[#allocation18 + $0x40] sm:$0xff] (!%p2253_p4), %v1922_v5 }
 0x607   : > { %1941 = vst [vmem:[#allocation18 + $0x58] sm:$0xff] (!%p2253_p4), %v1925_v2 }
 0x608   : > { %v2548_v29 = vpop.f32.mrb[36].mxu1  ;;  %1939 = vst [vmem:[#allocation18 + $0x48] sm:$0xff] (!%p2253_p4), %v1923_v41 }
 0x609   : > { %v1903_v30 = vadd.f32 %v2548_v29, %v2244_v21  ;;  %v1894_v31 = vpop.f32.mrb[37].mxu1 }
 0x60a   : > { %v1895_v62 = vadd.f32 %v2244_v21, %v1894_v31  ;;  %v2549_v32 = vpop.f32.mrb[38].mxu1 }
 0x60b   : > { %v1906_v63 = vadd.f32 %v2549_v32, %v2244_v21  ;;  %v1897_v58 = vpop.f32.mrb[39].mxu1  ;;  %v1928_v44 = vmax.f32 (!%p2253_p4), %v1903_v30, 0.0 }
 0x60c   : > { %v1898_v59 = vadd.f32 %v2244_v21, %v1897_v58  ;;  %v1926_v42 = vmax.f32 (!%p2253_p4), %v1895_v62, 0.0 }
 0x60d   : > { %v1929_v45 = vmax.f32 %v1906_v63, 0.0  ;;  %1944 = vst [vmem:[#allocation18 + $0x70] sm:$0xff] %v1928_v44 }
 0x60e   : > { %v1927_v43 = vmax.f32 %v1898_v59, 0.0  ;;  %1942 = vst [vmem:[#allocation18 + $0x60] sm:$0xff] %v1926_v42 }
 0x60f   : > { %1945 = vst [vmem:[#allocation18 + $0x78] sm:$0xff] %v1929_v45 }
 0x610   : > { %1943 = vst [vmem:[#allocation18 + $0x68] sm:$0xff] %v1927_v43 }
 0x611 PF: > { %p2254_p6 = scmp.ne.s32.totalorder %s3233_s29, 1 }
 0x612   : > { %1949 = vst [vmem:[#allocation18] sm:$0xff] (!%p2254_p6), %v3715_v60  ;;  %1950 = vst [vmem:[#allocation18 + $0x8] sm:$0xff] (!%p2254_p6), %v1850_v0 }
 0x613   : > { %1948 = sbr.rel (%p2254_p6) target bundleno = 1562 (0x61a), region = 120  ;;  %1951 = vst [vmem:[#allocation18 + $0x10] sm:$0xff] (!%p2254_p6), %v3713_v56  ;;  %1952 = vst [vmem:[#allocation18 + $0x18] sm:$0xff] (!%p2254_p6), %v3717_v19 }
 0x614   : > { %1953 = vst [vmem:[#allocation18 + $0x20] sm:$0xff] (!%p2254_p6), %v1863_v8  ;;  %1954 = vst [vmem:[#allocation18 + $0x28] sm:$0xff] (!%p2254_p6), %v1866_v16 }
 0x615   : > { %1955 = vst [vmem:[#allocation18 + $0x30] sm:$0xff] (!%p2254_p6), %v3719_v6  ;;  %1956 = vst [vmem:[#allocation18 + $0x38] sm:$0xff] (!%p2254_p6), %v1874_v13 }
 0x616   : > { %1957 = vst [vmem:[#allocation18 + $0x40] sm:$0xff] (!%p2254_p6), %v1879_v24  ;;  %1958 = vst [vmem:[#allocation18 + $0x48] sm:$0xff] (!%p2254_p6), %v1882_v28 }
 0x617   : > { %1959 = vst [vmem:[#allocation18 + $0x50] sm:$0xff] (!%p2254_p6), %v1887_v20  ;;  %1960 = vst [vmem:[#allocation18 + $0x58] sm:$0xff] (!%p2254_p6), %v1890_v26 }
 0x618   : > { %1961 = vst [vmem:[#allocation18 + $0x60] sm:$0xff] (!%p2254_p6), %v1895_v62  ;;  %1962 = vst [vmem:[#allocation18 + $0x68] sm:$0xff] (!%p2254_p6), %v1898_v59 }
 0x619   : > { %1963 = vst [vmem:[#allocation18 + $0x70] sm:$0xff] (!%p2254_p6), %v1903_v30  ;;  %1964 = vst [vmem:[#allocation18 + $0x78] sm:$0xff] (!%p2254_p6), %v1906_v63 }
 0x61a PF: > { %s3139_s7 = smov [#allocation18]  }
 0x61b   : > { %s1971_s22 = sshll.u32 %s3139_s7, 4  ;;  %s1972_s22 = int_to_ptr.vmem [resolvable:$true] %s1971_s22 }
 0x61c   : > { %s3042_s14 = scalar_lea.vmem %s1972_s22, 2048  ;;  %p3049_p1 = scmp.lt.s32.totalorder %s1972_s22, %s1972_s22 }
 0x61d   : > { %p3043_p13 = scmp.ne.s32.totalorder %s1972_s22, %s3042_s14  ;;  %p3050_p7 = scmp.lt.s32.totalorder %s3042_s14, %s3042_s14 }
 0x61f   : > { %p3044_p3 = pnand %p3043_p13, %p2253_p4  ;;  %p3051_p9 = por %p3050_p7, %p3049_p1 }
 0x621   : > { %p3045_p12 = pneg %p3044_p3 }
 0x623   : > { %p3052_p11 = pnand %p3051_p9, %p3045_p12 }
 0x625   : > { %3055 = shalt.err (!%p3052_p11)
}
 0x626   : > { %s3852_s16 = sld [smem:[#allocation37_spill]] }
 0x62c   : > { %s3056_s19 = scalar_lea.hbm %s3852_s16, 2048 }
 0x62d   : > { %p3057_p8 = scmp.ne.s32.totalorder %s3852_s16, %s3056_s19  ;;  %p3062_p0 = scmp.lt.u32.totalorder %s3056_s19, %s3852_s16 }
 0x62f   : > { %p3058_p2 = pnand %p3057_p8, %p2253_p4 }
 0x631   : > { %p3059_p10 = pneg %p3058_p2 }
 0x633   : > { %p3064_p5 = pnand %p3062_p0, %p3059_p10 }
 0x635   : > { %3067 = shalt.err (!%p3064_p5)
}
 0x636   : > { %s3140_s17 = smov 128   ;;  %s3141_s25 = smov 8  }
 0x637   : > { %2645 = dma.vmem_to_hbm [thread:$0]  (%p2253_p4), %s1972_s22, 2048, %s3852_s16, [#allocation4], %s3140_s17, %s3140_s17, %s3141_s25  }
 0x638   : > { %3109 = dma.done.wait (%p2253_p4), [#allocation4], 2048  }
 0x639   : > { %3111 = vsyncadd (%p2253_p4), [#allocation4], 4294965248 }
 0x63a PF: > { %s3853_s28 = sld [smem:[#allocation26_spill]]  ;;  %s3854_s20 = sld [smem:[#allocation27_spill]] }
 0x63b   : > { %s3855_s25 = smov %s3118_s26  ;;  %s3856_s26 = smov %s3122_s27 }
 0x640   : > { %p31_p6 = scmp.ge.s32.totalorder %s3853_s28, 4   ;;  %s3857_s27 = smov %s3854_s20 }
 0x642   :  { %33 = sbr.rel (!%p31_p6) target bundleno = 20 (0x14), region = 180 }
 0x649   :  { %1987 = vsyncpa [#allocation3], 1 }
 0x64a   :  { %1989 = vsyncpa [#allocation3 + $0x1], 1 }
 0x64b   :  { %1990 = vsyncpa [#allocation8], 1 }
 0x64c   :  { %1991 = vsyncpa [#allocation11], 1 }
 0x64d   :  { %1992 = vsyncpa [#allocation14], 1 }
 0x64e   :  { %1994 = vsyncpa [#allocation14 + $0x1], 1 }
 0x64f   :  { %1995 = vsyncpa [#allocation17], 1 }
 0x650   :  { %1997 = vsyncpa [#allocation17 + $0x1], 1 }
 0x651   :  { %1998 = vsyncpa [#allocation4], 1 }
 0x652   :  { %2000 = vsyncpa [#allocation4 + $0x1], 1 }
 0x653   :  { %2001 = vsyncpa [#allocation5], 1 }
 0x654   :  { %2003 = vsyncpa [#allocation5 + $0x1], 1 }

</bundles_post_ra>
